<compile_context>
chip_gen: v5e
topology: v5e:2x2
jax: 0.10.0
libtpu: 0.0.40
codegen_flags: <defaults>
</compile_context>

<pallas_src>
import math
from functools import partial

import jax
import jax.numpy as jnp
from jax import lax
from jax.experimental import pallas as pl
from jax.experimental.pallas import tpu as pltpu


# ----------------------------------------------------------------------------
# Kernel: time-blocked recurrence.  One grid step == TS LSTM time steps.
# ----------------------------------------------------------------------------
def _lstm_kernel(g_ref, whh_hbm_ref, hn_ref, h_ref, c_ref, whh_vmem_ref, *,
                 seq_len, guard_tail, unroll):
    """
    g_ref        : (TS, Bblk, 4Hp) bf16  gate pre-activations (x@W_ih^T + b)
    whh_hbm_ref  : (Hp, 4Hp)       bf16  W_hh^T in HBM (memory_space=ANY)
    hn_ref       : (Bblk, Hp)      f32   final hidden state (lane-dense out)
    h_ref, c_ref : (Bblk, Hp)      f32   carried state scratch
    whh_vmem_ref : (Hp, 4Hp)       bf16  resident single-buffer copy of W_hh^T
    """
    t = pl.program_id(1)

    @pl.when(t == 0)
    def _init():
        # Copy the grid-invariant recurrent weight exactly once into VMEM.
        pltpu.sync_copy(whh_hbm_ref, whh_vmem_ref)
        h_ref[...] = jnp.zeros_like(h_ref)
        c_ref[...] = jnp.zeros_like(c_ref)

    ts = g_ref.shape[0]            # static time-block size
    hp = h_ref.shape[-1]           # static, lane-aligned hidden width
    whh = whh_vmem_ref[...]        # resident bf16 weight

    def step(j, carry):
        h, c = carry
        # Recurrent matmul only (input part hoisted): bf16 operands, f32 acc.
        gates = g_ref[j].astype(jnp.float32) + jnp.dot(
            h.astype(whh.dtype), whh, preferred_element_type=jnp.float32)
        # Gate columns reordered to (i, f, o, g) in the wrapper: one sigmoid
        # over a contiguous 3*hp slab, one tanh over the last hp slab.
        sig = jax.nn.sigmoid(gates[:, :3 * hp])
        i_g = sig[:, 0 * hp:1 * hp]
        f_g = sig[:, 1 * hp:2 * hp]
        o_g = sig[:, 2 * hp:3 * hp]
        g_g = jnp.tanh(gates[:, 3 * hp:4 * hp])
        c_new = f_g * c + i_g * g_g
        h_new = o_g * jnp.tanh(c_new)
        if guard_tail:
            # Zero-padded trailing time steps are NOT inert (sigmoid(0)=0.5);
            # turn them into no-ops.
            valid = (t * ts + j) < seq_len
            h_new = jnp.where(valid, h_new, h)
            c_new = jnp.where(valid, c_new, c)
        return h_new, c_new

    h_fin, c_fin = lax.fori_loop(0, ts, step, (h_ref[...], c_ref[...]),
                                 unroll=unroll)
    h_ref[...] = h_fin
    c_ref[...] = c_fin

    @pl.when(t == pl.num_programs(1) - 1)
    def _final():
        hn_ref[...] = h_fin        # lane-dense (Bblk, Hp) h_n


# ----------------------------------------------------------------------------
# Wrapper / glue
# ----------------------------------------------------------------------------
def _ceil_to(x, m):
    return ((x + m - 1) // m) * m


def _pad_reorder_gate_cols(w, h, hp):
    """[in, 4h] (i,f,g,o) -> [in, 4hp] (i,f,o,g), each gate padded to hp."""
    blocks = [w[:, k * h:(k + 1) * h] for k in range(4)]
    order = (0, 1, 3, 2)                      # i, f, o, g
    return jnp.concatenate(
        [jnp.pad(blocks[k], ((0, 0), (0, hp - h))) for k in order], axis=1)


@partial(jax.jit, static_argnames=("time_block",))
def lstm_forward(tokens, params, time_block=32):
    """tokens: [B, S] int32 token ids -> logits [B, num_class] (f32)."""
    emb = params["embedding"]          # [V, E]
    wih_t = params["wih_t"]            # [E, 4H]   gate order i,f,g,o
    whh_t = params["whh_t"]            # [H, 4H]
    bias = params["bias"]              # [1, 4H]   (b_ih + b_hh)
    wfc_t = params["wfc_t"]            # [H, C]
    bfc = params["bfc"]                # [1, C]

    B, S = tokens.shape
    E = emb.shape[1]
    H = whh_t.shape[0]
    Hp = _ceil_to(H, 128)              # lane-align each gate slab
    Bp = _ceil_to(B, 8)                # sublane-align batch

    # ---- weight prep: gate-padded, reordered (i,f,o,g), matmuls in bf16 ----
    wih_p = _pad_reorder_gate_cols(wih_t, H, Hp).astype(jnp.bfloat16)   # [E,4Hp]
    whh_p = _pad_reorder_gate_cols(
        jnp.pad(whh_t, ((0, Hp - H), (0, 0))), H, Hp).astype(jnp.bfloat16)  # [Hp,4Hp]
    bias_p = _pad_reorder_gate_cols(bias, H, Hp)                        # [1,4Hp]

    # ---- hoist input-to-hidden matmul out of the serial recurrence --------
    # Gather time-major directly (tokens.T): no [B,S,E]->[S,B,E] HBM transpose.
    x = jnp.take(emb, tokens.T, axis=0)                                 # [S,B,E]
    g = jnp.dot(x.reshape(S * B, E).astype(jnp.bfloat16), wih_p,
                preferred_element_type=jnp.float32)                     # big MXU matmul
    g = (g + bias_p).astype(jnp.bfloat16).reshape(S, B, 4 * Hp)         # bf16 stream

    # ---- per-generation VMEM budget -> time-block size ---------------------
    try:
        vmem_cap = int(pltpu.get_tpu_info().vmem_capacity_bytes)
    except Exception:
        vmem_cap = 64 * 1024 * 1024            # conservative (v7x) fallback
    vmem_limit = (vmem_cap * 3) // 4           # 48 MiB on v7x, 96 MiB on v5e/v6e

    state_bytes = 3 * Bp * Hp * 4              # h, c scratch + out block (f32)
    weight_bytes = Hp * 4 * Hp * 2             # resident bf16 W_hh^T
    g_step_bytes = Bp * 4 * Hp * 2             # bf16 per time step
    budget = vmem_limit - state_bytes - weight_bytes - 4 * 1024 * 1024
    max_ts = max(1, budget // (2 * g_step_bytes))        # double-buffered g
    ts = max(1, min(int(time_block), S, int(max_ts)))    # no gcd cliff

    Sp = _ceil_to(S, ts)
    nt = Sp // ts
    guard_tail = Sp != S

    # Batch padding (sublanes) + optional time padding (guarded in-kernel).
    g = jnp.pad(g, ((0, Sp - S), (0, Bp - B), (0, 0)))                  # [Sp,Bp,4Hp]

    # Batch-parallel leading axis: only worth it for B >= ~16 (v7x 2 TCs).
    nb = 2 if (B >= 16 and Bp % 16 == 0) else 1
    bp_blk = Bp // nb

    # Unroll tuning: full unroll only if live gate tensors fit the vreg file.
    live_f32 = ts * bp_blk * 4 * Hp * 4
    unroll_steps = ts if live_f32 <= 192 * 1024 else min(ts, 4)

    kernel = partial(_lstm_kernel, seq_len=S, guard_tail=guard_tail,
                     unroll=unroll_steps)

    cost = pl.CostEstimate(
        flops=2 * Sp * Bp * Hp * 4 * Hp,
        transcendentals=Sp * Bp * 5 * Hp,
        bytes_accessed=Sp * Bp * 4 * Hp * 2 + Hp * 4 * Hp * 2 + Bp * Hp * 4,
    )

    h_all = pl.pallas_call(
        kernel,
        out_shape=jax.ShapeDtypeStruct((Bp, Hp), jnp.float32),
        grid_spec=pltpu.PrefetchScalarGridSpec(
            num_scalar_prefetch=0,
            grid=(nb, nt),
            in_specs=[
                pl.BlockSpec((ts, bp_blk, 4 * Hp), lambda b, t: (t, b, 0)),  # g
                pl.BlockSpec(memory_space=pl.ANY),                           # W_hh^T (HBM)
            ],
            out_specs=pl.BlockSpec((bp_blk, Hp), lambda b, t: (b, 0)),
            scratch_shapes=[
                pltpu.VMEM((bp_blk, Hp), jnp.float32),    # h
                pltpu.VMEM((bp_blk, Hp), jnp.float32),    # c
                pltpu.VMEM((Hp, 4 * Hp), jnp.bfloat16),   # resident W_hh^T
            ],
        ),
        compiler_params=pltpu.CompilerParams(
            dimension_semantics=("parallel", "arbitrary"),
            vmem_limit_bytes=int(vmem_limit),
        ),
        cost_estimate=cost,
    )(g, whh_p)

    # ---- tiny FC done in XLA (was moved out of the kernel) -----------------
    h_n = h_all[:B, :H]
    return h_n @ wfc_t + bfc


# ----------------------------------------------------------------------------
# Pure-JAX f32 reference (matches the PyTorch module's forward semantics)
# ----------------------------------------------------------------------------
def _reference_forward(tokens, params):
    emb = params["embedding"]
    x = jnp.take(emb, tokens, axis=0)                # [B, S, E]
    H = params["whh_t"].shape[0]
    B = tokens.shape[0]

    def step(carry, x_t):
        h, c = carry
        gates = x_t @ params["wih_t"] + h @ params["whh_t"] + params["bias"]
        i = jax.nn.sigmoid(gates[:, 0 * H:1 * H])
        f = jax.nn.sigmoid(gates[:, 1 * H:2 * H])
        g = jnp.tanh(gates[:, 2 * H:3 * H])
        o = jax.nn.sigmoid(gates[:, 3 * H:4 * H])
        c = f * c + i * g
        h = o * jnp.tanh(c)
        return (h, c), None

    h0 = jnp.zeros((B, H), jnp.float32)
    c0 = jnp.zeros((B, H), jnp.float32)
    (h, _), _ = lax.scan(step, (h0, c0), jnp.transpose(x, (1, 0, 2)))
    return h @ params["wfc_t"] + params["bfc"]


def init_params(key, vocab_size, embed_size, hidden_size, num_class):
    """Matches module.init(): every parameter ~ U(-1/sqrt(H), 1/sqrt(H))."""
    std = 1.0 / math.sqrt(hidden_size)
    ks = jax.random.split(key, 7)
    u = lambda k, shape: jax.random.uniform(
        k, shape, jnp.float32, minval=-std, maxval=std)
    H = hidden_size
    return {
        "embedding": u(ks[0], (vocab_size, embed_size)),
        # stored transposed: [in, 4H] / [H, 4H]; gate order i, f, g, o
        "wih_t": u(ks[1], (embed_size, 4 * H)),
        "whh_t": u(ks[2], (H, 4 * H)),
        # b_ih + b_hh folded into one bias row
        "bias": (u(ks[3], (1, 4 * H)) + u(ks[4], (1, 4 * H))),
        "wfc_t": u(ks[5], (H, num_class)),
        "bfc": u(ks[6], (1, num_class)),
    }


if __name__ == "__main__":
    VOCAB, EMBED, HIDDEN, NUM_CLASS = 50, 32, 32, 5
    BATCH, SEQ = 2, 8

    key = jax.random.PRNGKey(0)
    pkey, tkey = jax.random.split(key)
    params = init_params(pkey, VOCAB, EMBED, HIDDEN, NUM_CLASS)
    tokens = jax.random.randint(tkey, (BATCH, SEQ), 0, VOCAB, dtype=jnp.int32)

    logits = lstm_forward(tokens, params, time_block=32)
    logits = jax.block_until_ready(logits)

    ref = _reference_forward(tokens, params)
    assert logits.shape == (BATCH, NUM_CLASS)
    # Tolerance loosened vs. the pure-f32 reference because matmul operands
    # and the streamed gate pre-activations are bf16 (f32 accumulation;
    # elementwise gate math stays f32).
    max_err = float(jnp.max(jnp.abs(logits - ref)))
    assert jnp.allclose(logits, ref, atol=2e-2, rtol=2e-2), f"max abs err={max_err}"

    print("KERNEL_OK")
</pallas_src>

<mosaic_0001>
module attributes {stable_mosaic.version = 11 : i64} {
  func.func @_lstm_kernel(%arg0: i32, %arg1: i32, %arg2: memref<8x8x512xbf16, #tpu.memory_space<vmem>>, %arg3: memref<128x512xbf16, #tpu.memory_space<any>>, %arg4: memref<8x128xf32, #tpu.memory_space<vmem>>, %arg5: memref<8x128xf32, #tpu.memory_space<vmem>>, %arg6: memref<8x128xf32, #tpu.memory_space<vmem>>, %arg7: memref<128x512xbf16, #tpu.memory_space<vmem>>) attributes {dimension_semantics = [#tpu.dimension_semantics<parallel>, #tpu.dimension_semantics<arbitrary>], iteration_bounds = array<i64: 1, 1>, scalar_prefetch = 0 : i64, scratch_operands = 3 : i64, tpu.core_type = #tpu.core_type<tc>, window_params = [{transform_indices = @transform_0, window_bounds = array<i64: 8, 8, 512>}, {}, {transform_indices = @transform_2, window_bounds = array<i64: 8, 128>}]} {
    %c0_i32 = arith.constant 0 : i32
    %0 = arith.cmpi eq, %arg1, %c0_i32 : i32
    %1 = arith.extui %0 : i1 to i32
    %c0_i32_0 = arith.constant 0 : i32
    %2 = arith.cmpi ne, %1, %c0_i32_0 : i32
    scf.if %2 {
      "tpu.region"() ({
        %199 = tpu.sem_alloc : memref<!tpu.dma_semaphore, #tpu.memory_space<semaphore_mem>>
        tpu.enqueue_dma source(%arg3 : memref<128x512xbf16, #tpu.memory_space<any>>) target(%arg7 : memref<128x512xbf16, #tpu.memory_space<vmem>>) target_semaphore(%199 : memref<!tpu.dma_semaphore, #tpu.memory_space<semaphore_mem>>)
        tpu.wait_dma2 semaphore(%199 : memref<!tpu.dma_semaphore, #tpu.memory_space<semaphore_mem>>) src(%arg3 : memref<128x512xbf16, #tpu.memory_space<any>>) dst(%arg7 : memref<128x512xbf16, #tpu.memory_space<vmem>>)
        tpu.yield
      }) : () -> ()
      %cst_44 = arith.constant 0.000000e+00 : f32
      %195 = vector.broadcast %cst_44 : f32 to vector<8x128xf32>
      %c0_45 = arith.constant 0 : index
      %c0_46 = arith.constant 0 : index
      %196 = vector.load %arg5[%c0_45, %c0_46] : memref<8x128xf32, #tpu.memory_space<vmem>>, vector<8x128xf32>
      tpu.vector_store %arg5[%c0_45, %c0_46], %195 {strides = array<i32>} : memref<8x128xf32, #tpu.memory_space<vmem>>, vector<8x128xf32>,
      %cst_47 = arith.constant 0.000000e+00 : f32
      %197 = vector.broadcast %cst_47 : f32 to vector<8x128xf32>
      %c0_48 = arith.constant 0 : index
      %c0_49 = arith.constant 0 : index
      %198 = vector.load %arg6[%c0_48, %c0_49] : memref<8x128xf32, #tpu.memory_space<vmem>>, vector<8x128xf32>
      tpu.vector_store %arg6[%c0_48, %c0_49], %197 {strides = array<i32>} : memref<8x128xf32, #tpu.memory_space<vmem>>, vector<8x128xf32>,
    } else {
    }
    %c0 = arith.constant 0 : index
    %c0_1 = arith.constant 0 : index
    %3 = vector.load %arg7[%c0, %c0_1] : memref<128x512xbf16, #tpu.memory_space<vmem>>, vector<128x512xbf16>
    %c0_2 = arith.constant 0 : index
    %c0_3 = arith.constant 0 : index
    %4 = vector.load %arg5[%c0_2, %c0_3] : memref<8x128xf32, #tpu.memory_space<vmem>>, vector<8x128xf32>
    %c0_4 = arith.constant 0 : index
    %c0_5 = arith.constant 0 : index
    %5 = vector.load %arg6[%c0_4, %c0_5] : memref<8x128xf32, #tpu.memory_space<vmem>>, vector<8x128xf32>
    %c0_i32_6 = arith.constant 0 : i32
    %6 = arith.index_cast %c0_i32_6 : i32 to index
    %c0_7 = arith.constant 0 : index
    %c0_8 = arith.constant 0 : index
    %7 = vector.load %arg2[%6, %c0_7, %c0_8] : memref<8x8x512xbf16, #tpu.memory_space<vmem>>, vector<1x8x512xbf16>
    %8 = vector.shape_cast %7 : vector<1x8x512xbf16> to vector<8x512xbf16>
    %9 = arith.extf %8 : vector<8x512xbf16> to vector<8x512xf32>
    %10 = arith.truncf %4 : vector<8x128xf32> to vector<8x128xbf16>
    %cst = arith.constant dense<0.000000e+00> : vector<8x512xf32>
    %11 = tpu.matmul %10, %3, %cst {dimension_numbers = #tpu.dot_dimension_numbers<[1], [0], [0], [1], [0, 0, 1, 1], [], []>} : vector<8x128xbf16>, vector<128x512xbf16>, vector<8x512xf32> -> vector<8x512xf32>
    %12 = arith.addf %9, %11 : vector<8x512xf32>
    %13 = vector.extract_strided_slice %12 {offsets = [0, 0], sizes = [8, 384], strides = [1, 1]} : vector<8x512xf32> to vector<8x384xf32>
    %14 = arith.negf %13 : vector<8x384xf32>
    %15 = math.exp %14 : vector<8x384xf32>
    %cst_9 = arith.constant 1.000000e+00 : f32
    %16 = vector.broadcast %cst_9 : f32 to vector<8x384xf32>
    %17 = arith.addf %16, %15 : vector<8x384xf32>
    %18 = arith.divf %16, %17 : vector<8x384xf32>
    %19 = vector.extract_strided_slice %18 {offsets = [0, 0], sizes = [8, 128], strides = [1, 1]} : vector<8x384xf32> to vector<8x128xf32>
    %20 = vector.extract_strided_slice %18 {offsets = [0, 128], sizes = [8, 128], strides = [1, 1]} : vector<8x384xf32> to vector<8x128xf32>
    %21 = vector.extract_strided_slice %18 {offsets = [0, 256], sizes = [8, 128], strides = [1, 1]} : vector<8x384xf32> to vector<8x128xf32>
    %22 = vector.extract_strided_slice %12 {offsets = [0, 384], sizes = [8, 128], strides = [1, 1]} : vector<8x512xf32> to vector<8x128xf32>
    %23 = math.tanh %22 : vector<8x128xf32>
    %24 = arith.mulf %20, %5 : vector<8x128xf32>
    %25 = arith.mulf %19, %23 : vector<8x128xf32>
    %26 = arith.addf %24, %25 : vector<8x128xf32>
    %27 = math.tanh %26 : vector<8x128xf32>
    %28 = arith.mulf %21, %27 : vector<8x128xf32>
    %c1_i32 = arith.constant 1 : i32
    %29 = arith.index_cast %c1_i32 : i32 to index
    %c0_10 = arith.constant 0 : index
    %c0_11 = arith.constant 0 : index
    %30 = vector.load %arg2[%29, %c0_10, %c0_11] : memref<8x8x512xbf16, #tpu.memory_space<vmem>>, vector<1x8x512xbf16>
    %31 = vector.shape_cast %30 : vector<1x8x512xbf16> to vector<8x512xbf16>
    %32 = arith.extf %31 : vector<8x512xbf16> to vector<8x512xf32>
    %33 = arith.truncf %28 : vector<8x128xf32> to vector<8x128xbf16>
    %cst_12 = arith.constant dense<0.000000e+00> : vector<8x512xf32>
    %34 = tpu.matmul %33, %3, %cst_12 {dimension_numbers = #tpu.dot_dimension_numbers<[1], [0], [0], [1], [0, 0, 1, 1], [], []>} : vector<8x128xbf16>, vector<128x512xbf16>, vector<8x512xf32> -> vector<8x512xf32>
    %35 = arith.addf %32, %34 : vector<8x512xf32>
    %36 = vector.extract_strided_slice %35 {offsets = [0, 0], sizes = [8, 384], strides = [1, 1]} : vector<8x512xf32> to vector<8x384xf32>
    %37 = arith.negf %36 : vector<8x384xf32>
    %38 = math.exp %37 : vector<8x384xf32>
    %cst_13 = arith.constant 1.000000e+00 : f32
    %39 = vector.broadcast %cst_13 : f32 to vector<8x384xf32>
    %40 = arith.addf %39, %38 : vector<8x384xf32>
    %41 = arith.divf %39, %40 : vector<8x384xf32>
    %42 = vector.extract_strided_slice %41 {offsets = [0, 0], sizes = [8, 128], strides = [1, 1]} : vector<8x384xf32> to vector<8x128xf32>
    %43 = vector.extract_strided_slice %41 {offsets = [0, 128], sizes = [8, 128], strides = [1, 1]} : vector<8x384xf32> to vector<8x128xf32>
    %44 = vector.extract_strided_slice %41 {offsets = [0, 256], sizes = [8, 128], strides = [1, 1]} : vector<8x384xf32> to vector<8x128xf32>
    %45 = vector.extract_strided_slice %35 {offsets = [0, 384], sizes = [8, 128], strides = [1, 1]} : vector<8x512xf32> to vector<8x128xf32>
    %46 = math.tanh %45 : vector<8x128xf32>
    %47 = arith.mulf %43, %26 : vector<8x128xf32>
    %48 = arith.mulf %42, %46 : vector<8x128xf32>
    %49 = arith.addf %47, %48 : vector<8x128xf32>
    %50 = math.tanh %49 : vector<8x128xf32>
    %51 = arith.mulf %44, %50 : vector<8x128xf32>
    %c2_i32 = arith.constant 2 : i32
    %52 = arith.index_cast %c2_i32 : i32 to index
    %c0_14 = arith.constant 0 : index
    %c0_15 = arith.constant 0 : index
    %53 = vector.load %arg2[%52, %c0_14, %c0_15] : memref<8x8x512xbf16, #tpu.memory_space<vmem>>, vector<1x8x512xbf16>
    %54 = vector.shape_cast %53 : vector<1x8x512xbf16> to vector<8x512xbf16>
    %55 = arith.extf %54 : vector<8x512xbf16> to vector<8x512xf32>
    %56 = arith.truncf %51 : vector<8x128xf32> to vector<8x128xbf16>
    %cst_16 = arith.constant dense<0.000000e+00> : vector<8x512xf32>
    %57 = tpu.matmul %56, %3, %cst_16 {dimension_numbers = #tpu.dot_dimension_numbers<[1], [0], [0], [1], [0, 0, 1, 1], [], []>} : vector<8x128xbf16>, vector<128x512xbf16>, vector<8x512xf32> -> vector<8x512xf32>
    %58 = arith.addf %55, %57 : vector<8x512xf32>
    %59 = vector.extract_strided_slice %58 {offsets = [0, 0], sizes = [8, 384], strides = [1, 1]} : vector<8x512xf32> to vector<8x384xf32>
    %60 = arith.negf %59 : vector<8x384xf32>
    %61 = math.exp %60 : vector<8x384xf32>
    %cst_17 = arith.constant 1.000000e+00 : f32
    %62 = vector.broadcast %cst_17 : f32 to vector<8x384xf32>
    %63 = arith.addf %62, %61 : vector<8x384xf32>
    %64 = arith.divf %62, %63 : vector<8x384xf32>
    %65 = vector.extract_strided_slice %64 {offsets = [0, 0], sizes = [8, 128], strides = [1, 1]} : vector<8x384xf32> to vector<8x128xf32>
    %66 = vector.extract_strided_slice %64 {offsets = [0, 128], sizes = [8, 128], strides = [1, 1]} : vector<8x384xf32> to vector<8x128xf32>
    %67 = vector.extract_strided_slice %64 {offsets = [0, 256], sizes = [8, 128], strides = [1, 1]} : vector<8x384xf32> to vector<8x128xf32>
    %68 = vector.extract_strided_slice %58 {offsets = [0, 384], sizes = [8, 128], strides = [1, 1]} : vector<8x512xf32> to vector<8x128xf32>
    %69 = math.tanh %68 : vector<8x128xf32>
    %70 = arith.mulf %66, %49 : vector<8x128xf32>
    %71 = arith.mulf %65, %69 : vector<8x128xf32>
    %72 = arith.addf %70, %71 : vector<8x128xf32>
    %73 = math.tanh %72 : vector<8x128xf32>
    %74 = arith.mulf %67, %73 : vector<8x128xf32>
    %c3_i32 = arith.constant 3 : i32
    %75 = arith.index_cast %c3_i32 : i32 to index
    %c0_18 = arith.constant 0 : index
    %c0_19 = arith.constant 0 : index
    %76 = vector.load %arg2[%75, %c0_18, %c0_19] : memref<8x8x512xbf16, #tpu.memory_space<vmem>>, vector<1x8x512xbf16>
    %77 = vector.shape_cast %76 : vector<1x8x512xbf16> to vector<8x512xbf16>
    %78 = arith.extf %77 : vector<8x512xbf16> to vector<8x512xf32>
    %79 = arith.truncf %74 : vector<8x128xf32> to vector<8x128xbf16>
    %cst_20 = arith.constant dense<0.000000e+00> : vector<8x512xf32>
    %80 = tpu.matmul %79, %3, %cst_20 {dimension_numbers = #tpu.dot_dimension_numbers<[1], [0], [0], [1], [0, 0, 1, 1], [], []>} : vector<8x128xbf16>, vector<128x512xbf16>, vector<8x512xf32> -> vector<8x512xf32>
    %81 = arith.addf %78, %80 : vector<8x512xf32>
    %82 = vector.extract_strided_slice %81 {offsets = [0, 0], sizes = [8, 384], strides = [1, 1]} : vector<8x512xf32> to vector<8x384xf32>
    %83 = arith.negf %82 : vector<8x384xf32>
    %84 = math.exp %83 : vector<8x384xf32>
    %cst_21 = arith.constant 1.000000e+00 : f32
    %85 = vector.broadcast %cst_21 : f32 to vector<8x384xf32>
    %86 = arith.addf %85, %84 : vector<8x384xf32>
    %87 = arith.divf %85, %86 : vector<8x384xf32>
    %88 = vector.extract_strided_slice %87 {offsets = [0, 0], sizes = [8, 128], strides = [1, 1]} : vector<8x384xf32> to vector<8x128xf32>
    %89 = vector.extract_strided_slice %87 {offsets = [0, 128], sizes = [8, 128], strides = [1, 1]} : vector<8x384xf32> to vector<8x128xf32>
    %90 = vector.extract_strided_slice %87 {offsets = [0, 256], sizes = [8, 128], strides = [1, 1]} : vector<8x384xf32> to vector<8x128xf32>
    %91 = vector.extract_strided_slice %81 {offsets = [0, 384], sizes = [8, 128], strides = [1, 1]} : vector<8x512xf32> to vector<8x128xf32>
    %92 = math.tanh %91 : vector<8x128xf32>
    %93 = arith.mulf %89, %72 : vector<8x128xf32>
    %94 = arith.mulf %88, %92 : vector<8x128xf32>
    %95 = arith.addf %93, %94 : vector<8x128xf32>
    %96 = math.tanh %95 : vector<8x128xf32>
    %97 = arith.mulf %90, %96 : vector<8x128xf32>
    %c4_i32 = arith.constant 4 : i32
    %98 = arith.index_cast %c4_i32 : i32 to index
    %c0_22 = arith.constant 0 : index
    %c0_23 = arith.constant 0 : index
    %99 = vector.load %arg2[%98, %c0_22, %c0_23] : memref<8x8x512xbf16, #tpu.memory_space<vmem>>, vector<1x8x512xbf16>
    %100 = vector.shape_cast %99 : vector<1x8x512xbf16> to vector<8x512xbf16>
    %101 = arith.extf %100 : vector<8x512xbf16> to vector<8x512xf32>
    %102 = arith.truncf %97 : vector<8x128xf32> to vector<8x128xbf16>
    %cst_24 = arith.constant dense<0.000000e+00> : vector<8x512xf32>
    %103 = tpu.matmul %102, %3, %cst_24 {dimension_numbers = #tpu.dot_dimension_numbers<[1], [0], [0], [1], [0, 0, 1, 1], [], []>} : vector<8x128xbf16>, vector<128x512xbf16>, vector<8x512xf32> -> vector<8x512xf32>
    %104 = arith.addf %101, %103 : vector<8x512xf32>
    %105 = vector.extract_strided_slice %104 {offsets = [0, 0], sizes = [8, 384], strides = [1, 1]} : vector<8x512xf32> to vector<8x384xf32>
    %106 = arith.negf %105 : vector<8x384xf32>
    %107 = math.exp %106 : vector<8x384xf32>
    %cst_25 = arith.constant 1.000000e+00 : f32
    %108 = vector.broadcast %cst_25 : f32 to vector<8x384xf32>
    %109 = arith.addf %108, %107 : vector<8x384xf32>
    %110 = arith.divf %108, %109 : vector<8x384xf32>
    %111 = vector.extract_strided_slice %110 {offsets = [0, 0], sizes = [8, 128], strides = [1, 1]} : vector<8x384xf32> to vector<8x128xf32>
    %112 = vector.extract_strided_slice %110 {offsets = [0, 128], sizes = [8, 128], strides = [1, 1]} : vector<8x384xf32> to vector<8x128xf32>
    %113 = vector.extract_strided_slice %110 {offsets = [0, 256], sizes = [8, 128], strides = [1, 1]} : vector<8x384xf32> to vector<8x128xf32>
    %114 = vector.extract_strided_slice %104 {offsets = [0, 384], sizes = [8, 128], strides = [1, 1]} : vector<8x512xf32> to vector<8x128xf32>
    %115 = math.tanh %114 : vector<8x128xf32>
    %116 = arith.mulf %112, %95 : vector<8x128xf32>
    %117 = arith.mulf %111, %115 : vector<8x128xf32>
    %118 = arith.addf %116, %117 : vector<8x128xf32>
    %119 = math.tanh %118 : vector<8x128xf32>
    %120 = arith.mulf %113, %119 : vector<8x128xf32>
    %c5_i32 = arith.constant 5 : i32
    %121 = arith.index_cast %c5_i32 : i32 to index
    %c0_26 = arith.constant 0 : index
    %c0_27 = arith.constant 0 : index
    %122 = vector.load %arg2[%121, %c0_26, %c0_27] : memref<8x8x512xbf16, #tpu.memory_space<vmem>>, vector<1x8x512xbf16>
    %123 = vector.shape_cast %122 : vector<1x8x512xbf16> to vector<8x512xbf16>
    %124 = arith.extf %123 : vector<8x512xbf16> to vector<8x512xf32>
    %125 = arith.truncf %120 : vector<8x128xf32> to vector<8x128xbf16>
    %cst_28 = arith.constant dense<0.000000e+00> : vector<8x512xf32>
    %126 = tpu.matmul %125, %3, %cst_28 {dimension_numbers = #tpu.dot_dimension_numbers<[1], [0], [0], [1], [0, 0, 1, 1], [], []>} : vector<8x128xbf16>, vector<128x512xbf16>, vector<8x512xf32> -> vector<8x512xf32>
    %127 = arith.addf %124, %126 : vector<8x512xf32>
    %128 = vector.extract_strided_slice %127 {offsets = [0, 0], sizes = [8, 384], strides = [1, 1]} : vector<8x512xf32> to vector<8x384xf32>
    %129 = arith.negf %128 : vector<8x384xf32>
    %130 = math.exp %129 : vector<8x384xf32>
    %cst_29 = arith.constant 1.000000e+00 : f32
    %131 = vector.broadcast %cst_29 : f32 to vector<8x384xf32>
    %132 = arith.addf %131, %130 : vector<8x384xf32>
    %133 = arith.divf %131, %132 : vector<8x384xf32>
    %134 = vector.extract_strided_slice %133 {offsets = [0, 0], sizes = [8, 128], strides = [1, 1]} : vector<8x384xf32> to vector<8x128xf32>
    %135 = vector.extract_strided_slice %133 {offsets = [0, 128], sizes = [8, 128], strides = [1, 1]} : vector<8x384xf32> to vector<8x128xf32>
    %136 = vector.extract_strided_slice %133 {offsets = [0, 256], sizes = [8, 128], strides = [1, 1]} : vector<8x384xf32> to vector<8x128xf32>
    %137 = vector.extract_strided_slice %127 {offsets = [0, 384], sizes = [8, 128], strides = [1, 1]} : vector<8x512xf32> to vector<8x128xf32>
    %138 = math.tanh %137 : vector<8x128xf32>
    %139 = arith.mulf %135, %118 : vector<8x128xf32>
    %140 = arith.mulf %134, %138 : vector<8x128xf32>
    %141 = arith.addf %139, %140 : vector<8x128xf32>
    %142 = math.tanh %141 : vector<8x128xf32>
    %143 = arith.mulf %136, %142 : vector<8x128xf32>
    %c6_i32 = arith.constant 6 : i32
    %144 = arith.index_cast %c6_i32 : i32 to index
    %c0_30 = arith.constant 0 : index
    %c0_31 = arith.constant 0 : index
    %145 = vector.load %arg2[%144, %c0_30, %c0_31] : memref<8x8x512xbf16, #tpu.memory_space<vmem>>, vector<1x8x512xbf16>
    %146 = vector.shape_cast %145 : vector<1x8x512xbf16> to vector<8x512xbf16>
    %147 = arith.extf %146 : vector<8x512xbf16> to vector<8x512xf32>
    %148 = arith.truncf %143 : vector<8x128xf32> to vector<8x128xbf16>
    %cst_32 = arith.constant dense<0.000000e+00> : vector<8x512xf32>
    %149 = tpu.matmul %148, %3, %cst_32 {dimension_numbers = #tpu.dot_dimension_numbers<[1], [0], [0], [1], [0, 0, 1, 1], [], []>} : vector<8x128xbf16>, vector<128x512xbf16>, vector<8x512xf32> -> vector<8x512xf32>
    %150 = arith.addf %147, %149 : vector<8x512xf32>
    %151 = vector.extract_strided_slice %150 {offsets = [0, 0], sizes = [8, 384], strides = [1, 1]} : vector<8x512xf32> to vector<8x384xf32>
    %152 = arith.negf %151 : vector<8x384xf32>
    %153 = math.exp %152 : vector<8x384xf32>
    %cst_33 = arith.constant 1.000000e+00 : f32
    %154 = vector.broadcast %cst_33 : f32 to vector<8x384xf32>
    %155 = arith.addf %154, %153 : vector<8x384xf32>
    %156 = arith.divf %154, %155 : vector<8x384xf32>
    %157 = vector.extract_strided_slice %156 {offsets = [0, 0], sizes = [8, 128], strides = [1, 1]} : vector<8x384xf32> to vector<8x128xf32>
    %158 = vector.extract_strided_slice %156 {offsets = [0, 128], sizes = [8, 128], strides = [1, 1]} : vector<8x384xf32> to vector<8x128xf32>
    %159 = vector.extract_strided_slice %156 {offsets = [0, 256], sizes = [8, 128], strides = [1, 1]} : vector<8x384xf32> to vector<8x128xf32>
    %160 = vector.extract_strided_slice %150 {offsets = [0, 384], sizes = [8, 128], strides = [1, 1]} : vector<8x512xf32> to vector<8x128xf32>
    %161 = math.tanh %160 : vector<8x128xf32>
    %162 = arith.mulf %158, %141 : vector<8x128xf32>
    %163 = arith.mulf %157, %161 : vector<8x128xf32>
    %164 = arith.addf %162, %163 : vector<8x128xf32>
    %165 = math.tanh %164 : vector<8x128xf32>
    %166 = arith.mulf %159, %165 : vector<8x128xf32>
    %c7_i32 = arith.constant 7 : i32
    %167 = arith.index_cast %c7_i32 : i32 to index
    %c0_34 = arith.constant 0 : index
    %c0_35 = arith.constant 0 : index
    %168 = vector.load %arg2[%167, %c0_34, %c0_35] : memref<8x8x512xbf16, #tpu.memory_space<vmem>>, vector<1x8x512xbf16>
    %169 = vector.shape_cast %168 : vector<1x8x512xbf16> to vector<8x512xbf16>
    %170 = arith.extf %169 : vector<8x512xbf16> to vector<8x512xf32>
    %171 = arith.truncf %166 : vector<8x128xf32> to vector<8x128xbf16>
    %cst_36 = arith.constant dense<0.000000e+00> : vector<8x512xf32>
    %172 = tpu.matmul %171, %3, %cst_36 {dimension_numbers = #tpu.dot_dimension_numbers<[1], [0], [0], [1], [0, 0, 1, 1], [], []>} : vector<8x128xbf16>, vector<128x512xbf16>, vector<8x512xf32> -> vector<8x512xf32>
    %173 = arith.addf %170, %172 : vector<8x512xf32>
    %174 = vector.extract_strided_slice %173 {offsets = [0, 0], sizes = [8, 384], strides = [1, 1]} : vector<8x512xf32> to vector<8x384xf32>
    %175 = arith.negf %174 : vector<8x384xf32>
    %176 = math.exp %175 : vector<8x384xf32>
    %cst_37 = arith.constant 1.000000e+00 : f32
    %177 = vector.broadcast %cst_37 : f32 to vector<8x384xf32>
    %178 = arith.addf %177, %176 : vector<8x384xf32>
    %179 = arith.divf %177, %178 : vector<8x384xf32>
    %180 = vector.extract_strided_slice %179 {offsets = [0, 0], sizes = [8, 128], strides = [1, 1]} : vector<8x384xf32> to vector<8x128xf32>
    %181 = vector.extract_strided_slice %179 {offsets = [0, 128], sizes = [8, 128], strides = [1, 1]} : vector<8x384xf32> to vector<8x128xf32>
    %182 = vector.extract_strided_slice %179 {offsets = [0, 256], sizes = [8, 128], strides = [1, 1]} : vector<8x384xf32> to vector<8x128xf32>
    %183 = vector.extract_strided_slice %173 {offsets = [0, 384], sizes = [8, 128], strides = [1, 1]} : vector<8x512xf32> to vector<8x128xf32>
    %184 = math.tanh %183 : vector<8x128xf32>
    %185 = arith.mulf %181, %164 : vector<8x128xf32>
    %186 = arith.mulf %180, %184 : vector<8x128xf32>
    %187 = arith.addf %185, %186 : vector<8x128xf32>
    %188 = math.tanh %187 : vector<8x128xf32>
    %189 = arith.mulf %182, %188 : vector<8x128xf32>
    %c8_i32 = arith.constant 8 : i32
    %c0_38 = arith.constant 0 : index
    %c0_39 = arith.constant 0 : index
    %190 = vector.load %arg5[%c0_38, %c0_39] : memref<8x128xf32, #tpu.memory_space<vmem>>, vector<8x128xf32>
    tpu.vector_store %arg5[%c0_38, %c0_39], %189 {strides = array<i32>} : memref<8x128xf32, #tpu.memory_space<vmem>>, vector<8x128xf32>,
    %c0_40 = arith.constant 0 : index
    %c0_41 = arith.constant 0 : index
    %191 = vector.load %arg6[%c0_40, %c0_41] : memref<8x128xf32, #tpu.memory_space<vmem>>, vector<8x128xf32>
    tpu.vector_store %arg6[%c0_40, %c0_41], %187 {strides = array<i32>} : memref<8x128xf32, #tpu.memory_space<vmem>>, vector<8x128xf32>,
    %c0_i32_42 = arith.constant 0 : i32
    %192 = arith.cmpi eq, %arg1, %c0_i32_42 : i32
    %193 = arith.extui %192 : i1 to i32
    %c0_i32_43 = arith.constant 0 : i32
    %194 = arith.cmpi ne, %193, %c0_i32_43 : i32
    scf.if %194 {
      %c0_44 = arith.constant 0 : index
      %c0_45 = arith.constant 0 : index
      %195 = vector.load %arg4[%c0_44, %c0_45] : memref<8x128xf32, #tpu.memory_space<vmem>>, vector<8x128xf32>
      tpu.vector_store %arg4[%c0_44, %c0_45], %189 {strides = array<i32>} : memref<8x128xf32, #tpu.memory_space<vmem>>, vector<8x128xf32>,
    } else {
    }
    return
  }
  func.func @transform_0(%arg0: i32, %arg1: i32) -> (i32, i32, i32) {
    %c0_i32 = arith.constant 0 : i32
    %c0_i32_0 = arith.constant 0 : i32
    return %arg1, %arg0, %c0_i32 : i32, i32, i32
  }
  func.func @transform_2(%arg0: i32, %arg1: i32) -> (i32, i32) {
    %c0_i32 = arith.constant 0 : i32
    %c0_i32_0 = arith.constant 0 : i32
    return %arg0, %c0_i32 : i32, i32
  }
}

</mosaic_0001>

<bundles_post_ra>
// kernel: lstm_forward.1
= control target key start
LH: loop header
LB: loop body
LE: loop exit
PB: predicated region body
PF: predicated region fallthrough
CT: control target
= control target key end

     0   :  { %s2162_s0 = inlined_call_operand.vmem [shape: bf16[8,8,512], index: 0, kind: input, shape index: {}]   ;;  %s2163_s1 = inlined_call_operand.vmem [shape: bf16[128,512], index: 1, kind: input, shape index: {}]   ;;  %s2164_s2 = inlined_call_operand.vmem [shape: f32[8,128], index: 2, kind: output, shape index: {}]  }
   0x1   :  { %v23_v0 = vld [vmem:[%s2163_s1] sm:$0xff]  ;;  %v25_v1 = vld [vmem:[%s2163_s1 + $0x8] sm:$0xff]  ;;  %v27_v2 = vld [vmem:[%s2163_s1 + $0x10] sm:$0xff] }
   0x2   :  { %24 = vst [vmem:[#allocation4] sm:$0xff] %v23_v0  ;;  %v29_v3 = vld [vmem:[%s2163_s1 + $0x18] sm:$0xff]  ;;  %v31_v4 = vld [vmem:[%s2163_s1 + $0x20] sm:$0xff]  ;;  %v33_v5 = vld [vmem:[%s2163_s1 + $0x28] sm:$0xff] }
   0x3   :  { %26 = vst [vmem:[#allocation4 + $0x8] sm:$0xff] %v25_v1  ;;  %v35_v6 = vld [vmem:[%s2163_s1 + $0x30] sm:$0xff]  ;;  %v37_v7 = vld [vmem:[%s2163_s1 + $0x38] sm:$0xff]  ;;  %v39_v8 = vld [vmem:[%s2163_s1 + $0x40] sm:$0xff] }
   0x4   :  { %28 = vst [vmem:[#allocation4 + $0x10] sm:$0xff] %v27_v2  ;;  %v41_v9 = vld [vmem:[%s2163_s1 + $0x48] sm:$0xff]  ;;  %v43_v10 = vld [vmem:[%s2163_s1 + $0x50] sm:$0xff]  ;;  %v45_v11 = vld [vmem:[%s2163_s1 + $0x58] sm:$0xff] }
   0x5   :  { %30 = vst [vmem:[#allocation4 + $0x18] sm:$0xff] %v29_v3  ;;  %v47_v12 = vld [vmem:[%s2163_s1 + $0x60] sm:$0xff]  ;;  %v49_v13 = vld [vmem:[%s2163_s1 + $0x68] sm:$0xff]  ;;  %v51_v14 = vld [vmem:[%s2163_s1 + $0x70] sm:$0xff] }
   0x6   :  { %32 = vst [vmem:[#allocation4 + $0x20] sm:$0xff] %v31_v4  ;;  %v53_v15 = vld [vmem:[%s2163_s1 + $0x78] sm:$0xff]  ;;  %v55_v16 = vld [vmem:[%s2163_s1 + $0x80] sm:$0xff]  ;;  %v57_v17 = vld [vmem:[%s2163_s1 + $0x88] sm:$0xff] }
   0x7   :  { %34 = vst [vmem:[#allocation4 + $0x28] sm:$0xff] %v33_v5  ;;  %v59_v18 = vld [vmem:[%s2163_s1 + $0x90] sm:$0xff]  ;;  %v61_v19 = vld [vmem:[%s2163_s1 + $0x98] sm:$0xff]  ;;  %v63_v20 = vld [vmem:[%s2163_s1 + $0xa0] sm:$0xff] }
   0x8   :  { %36 = vst [vmem:[#allocation4 + $0x30] sm:$0xff] %v35_v6  ;;  %v65_v21 = vld [vmem:[%s2163_s1 + $0xa8] sm:$0xff]  ;;  %v67_v22 = vld [vmem:[%s2163_s1 + $0xb0] sm:$0xff]  ;;  %v69_v23 = vld [vmem:[%s2163_s1 + $0xb8] sm:$0xff] }
   0x9   :  { %38 = vst [vmem:[#allocation4 + $0x38] sm:$0xff] %v37_v7  ;;  %v71_v24 = vld [vmem:[%s2163_s1 + $0xc0] sm:$0xff]  ;;  %v73_v25 = vld [vmem:[%s2163_s1 + $0xc8] sm:$0xff]  ;;  %v75_v26 = vld [vmem:[%s2163_s1 + $0xd0] sm:$0xff] }
   0xa   :  { %40 = vst [vmem:[#allocation4 + $0x40] sm:$0xff] %v39_v8  ;;  %v77_v27 = vld [vmem:[%s2163_s1 + $0xd8] sm:$0xff]  ;;  %v79_v28 = vld [vmem:[%s2163_s1 + $0xe0] sm:$0xff]  ;;  %v81_v29 = vld [vmem:[%s2163_s1 + $0xe8] sm:$0xff] }
   0xb   :  { %42 = vst [vmem:[#allocation4 + $0x48] sm:$0xff] %v41_v9  ;;  %v83_v30 = vld [vmem:[%s2163_s1 + $0xf0] sm:$0xff]  ;;  %v85_v31 = vld [vmem:[%s2163_s1 + $0xf8] sm:$0xff] }
   0xc   :  { %44 = vst [vmem:[#allocation4 + $0x50] sm:$0xff] %v43_v10 }
   0xd   :  { %46 = vst [vmem:[#allocation4 + $0x58] sm:$0xff] %v45_v11 }
   0xe   :  { %48 = vst [vmem:[#allocation4 + $0x60] sm:$0xff] %v47_v12 }
   0xf   :  { %50 = vst [vmem:[#allocation4 + $0x68] sm:$0xff] %v49_v13 }
  0x10   :  { %52 = vst [vmem:[#allocation4 + $0x70] sm:$0xff] %v51_v14 }
  0x11   :  { %54 = vst [vmem:[#allocation4 + $0x78] sm:$0xff] %v53_v15 }
  0x12   :  { %56 = vst [vmem:[#allocation4 + $0x80] sm:$0xff] %v55_v16 }
  0x13   :  { %58 = vst [vmem:[#allocation4 + $0x88] sm:$0xff] %v57_v17 }
  0x14   :  { %60 = vst [vmem:[#allocation4 + $0x90] sm:$0xff] %v59_v18 }
  0x15   :  { %62 = vst [vmem:[#allocation4 + $0x98] sm:$0xff] %v61_v19 }
  0x16   :  { %64 = vst [vmem:[#allocation4 + $0xa0] sm:$0xff] %v63_v20 }
  0x17   :  { %66 = vst [vmem:[#allocation4 + $0xa8] sm:$0xff] %v65_v21 }
  0x18   :  { %68 = vst [vmem:[#allocation4 + $0xb0] sm:$0xff] %v67_v22 }
  0x19   :  { %70 = vst [vmem:[#allocation4 + $0xb8] sm:$0xff] %v69_v23 }
  0x1a   :  { %72 = vst [vmem:[#allocation4 + $0xc0] sm:$0xff] %v71_v24 }
  0x1b   :  { %74 = vst [vmem:[#allocation4 + $0xc8] sm:$0xff] %v73_v25 }
  0x1c   :  { %76 = vst [vmem:[#allocation4 + $0xd0] sm:$0xff] %v75_v26 }
  0x1d   :  { %78 = vst [vmem:[#allocation4 + $0xd8] sm:$0xff] %v77_v27 }
  0x1e   :  { %80 = vst [vmem:[#allocation4 + $0xe0] sm:$0xff] %v79_v28 }
  0x1f   :  { %82 = vst [vmem:[#allocation4 + $0xe8] sm:$0xff] %v81_v29 }
  0x20   :  { %84 = vst [vmem:[#allocation4 + $0xf0] sm:$0xff] %v83_v30 }
  0x21   :  { %86 = vst [vmem:[#allocation4 + $0xf8] sm:$0xff] %v85_v31 }
  0x22   :  { %92 = vsyncadd [#allocation5], 4096 }
  0x23   :  { %1649 = dma.done.wait [#allocation5], 4096 }
  0x24   :  { %1650 = vsyncadd [#allocation5], 4294963200  ;;  %v1420_v41 = vld [vmem:[#allocation4 + $0xc0] sm:$0xf]  ;;  %v1514_v42 = vld [vmem:[#allocation4 + $0xcc] sm:$0xf0] }
  0x25   :  { %v1436_v32 = vld [vmem:[#allocation4 + $0xe0] sm:$0xf]  ;;  %v1516_v34 = vld [vmem:[#allocation4 + $0xe4] sm:$0xf]  ;;  %v1770_v44 = vor.u32 %v1514_v42, %v1420_v41  ;;  %v1422_v45 = vld [vmem:[#allocation4 + $0xd0] sm:$0xf0] }
  0x26   :  { %v1444_v37 = vld [vmem:[#allocation4 + $0xe8] sm:$0xf]  ;;  %v1512_v43 = vld [vmem:[#allocation4 + $0xc4] sm:$0xf]  ;;  %v1515_v47 = vld [vmem:[#allocation4 + $0xd4] sm:$0xf0] }
  0x27   :  { %v1518_v33 = vld [vmem:[#allocation4 + $0xec] sm:$0xf0]  ;;  %v1438_v36 = vld [vmem:[#allocation4 + $0xf0] sm:$0xf0]  ;;  %v1428_v46 = vld [vmem:[#allocation4 + $0xc8] sm:$0xf]  ;;  %v1774_v48 = vor.u32 %v1512_v43, %v1422_v45 }
  0x28   :  { %v1763_v35 = vor.u32 %v1518_v33, %v1436_v32  ;;  %v1519_v38 = vld [vmem:[#allocation4 + $0xf4] sm:$0xf0]  ;;  %v1765_v39 = vor.u32 %v1516_v34, %v1438_v36  ;;  %v1776_v49 = vor.u32 %v1515_v47, %v1428_v46  ;;  %v1517_v50 = vld [vmem:[#allocation4 + $0xec] sm:$0xf]  ;;  %v1446_v51 = vld [vmem:[#allocation4 + $0xf8] sm:$0xf0] }
  0x29   :  { %v1767_v40 = vor.u32 %v1519_v38, %v1444_v37  ;;  %v1404_v52 = vld [vmem:[#allocation4 + $0xa0] sm:$0xf]  ;;  %v1778_v53 = vor.u32 %v1517_v50, %v1446_v51  ;;  %v1510_v54 = vld [vmem:[#allocation4 + $0xac] sm:$0xf0]  ;;  %v1508_v55 = vld [vmem:[#allocation4 + $0xa4] sm:$0xf] }
  0x2a   :  { %300 = vmatpush.bf16.msra.mxu0 %v1763_v35  ;;  %313 = vmatpush.bf16.msra.mxu1 %v1765_v39  ;;  %v1406_v56 = vld [vmem:[#allocation4 + $0xb0] sm:$0xf0]  ;;  %v1412_v57 = vld [vmem:[#allocation4 + $0xa8] sm:$0xf]  ;;  %v1511_v58 = vld [vmem:[#allocation4 + $0xb4] sm:$0xf0]  ;;  %v1782_v60 = vor.u32 %v1510_v54, %v1404_v52 }
  0x2b   :  { %326 = vmatpush.bf16.msra.mxu2 %v1767_v40  ;;  %v1513_v59 = vld [vmem:[#allocation4 + $0xcc] sm:$0xf]  ;;  %339 = vmatpush.bf16.msra.mxu3 %v1778_v53  ;;  %v1430_v61 = vld [vmem:[#allocation4 + $0xd8] sm:$0xf0]  ;;  %v1388_v62 = vld [vmem:[#allocation4 + $0x80] sm:$0xf]  ;;  %v1786_v0 = vor.u32 %v1508_v55, %v1406_v56  ;;  %v1788_v1 = vor.u32 %v1511_v58, %v1412_v57 }
  0x2c   :  { %v1506_v63 = vld [vmem:[#allocation4 + $0x8c] sm:$0xf0]  ;;  %v1790_v2 = vor.u32 %v1513_v59, %v1430_v61  ;;  %v1504_v3 = vld [vmem:[#allocation4 + $0x84] sm:$0xf]  ;;  %v1390_v4 = vld [vmem:[#allocation4 + $0x90] sm:$0xf0] }
  0x2d   :  { %v1396_v5 = vld [vmem:[#allocation4 + $0x88] sm:$0xf]  ;;  %v1507_v6 = vld [vmem:[#allocation4 + $0x94] sm:$0xf0]  ;;  %v1509_v7 = vld [vmem:[#allocation4 + $0xac] sm:$0xf]  ;;  %v1794_v9 = vor.u32 %v1506_v63, %v1388_v62  ;;  %v1800_v13 = vor.u32 %v1504_v3, %v1390_v4 }
  0x2e   :  { %301 = vmatpush.bf16.msra.mxu0 %v1770_v44  ;;  %314 = vmatpush.bf16.msra.mxu1 %v1774_v48  ;;  %v1414_v8 = vld [vmem:[#allocation4 + $0xb8] sm:$0xf0]  ;;  %v1372_v11 = vld [vmem:[#allocation4 + $0x60] sm:$0xf]  ;;  %v1502_v12 = vld [vmem:[#allocation4 + $0x6c] sm:$0xf0]  ;;  %v1802_v14 = vor.u32 %v1507_v6, %v1396_v5 }
  0x2f   :  { %327 = vmatpush.bf16.msra.mxu2 %v1776_v49  ;;  %340 = vmatpush.bf16.msra.mxu3 %v1790_v2  ;;  %v1796_v10 = vor.u32 %v1509_v7, %v1414_v8  ;;  %v1500_v15 = vld [vmem:[#allocation4 + $0x64] sm:$0xf]  ;;  %v1505_v16 = vld [vmem:[#allocation4 + $0x8c] sm:$0xf]  ;;  %v1398_v17 = vld [vmem:[#allocation4 + $0x98] sm:$0xf0]  ;;  %v1806_v21 = vor.u32 %v1502_v12, %v1372_v11 }
  0x30   :  { %v1374_v18 = vld [vmem:[#allocation4 + $0x70] sm:$0xf0]  ;;  %v1380_v19 = vld [vmem:[#allocation4 + $0x68] sm:$0xf]  ;;  %v1503_v20 = vld [vmem:[#allocation4 + $0x74] sm:$0xf0]  ;;  %v1808_v22 = vor.u32 %v1505_v16, %v1398_v17 }
  0x31   :  { %v1356_v23 = vld [vmem:[#allocation4 + $0x40] sm:$0xf]  ;;  %v1498_v24 = vld [vmem:[#allocation4 + $0x4c] sm:$0xf0]  ;;  %v1812_v25 = vor.u32 %v1500_v15, %v1374_v18  ;;  %v1814_v26 = vor.u32 %v1503_v20, %v1380_v19  ;;  %v1496_v27 = vld [vmem:[#allocation4 + $0x44] sm:$0xf] }
  0x32   :  { %302 = vmatpush.bf16.msra.mxu0 %v1782_v60  ;;  %315 = vmatpush.bf16.msra.mxu1 %v1786_v0  ;;  %v1501_v28 = vld [vmem:[#allocation4 + $0x6c] sm:$0xf]  ;;  %v1382_v29 = vld [vmem:[#allocation4 + $0x78] sm:$0xf0]  ;;  %v1358_v30 = vld [vmem:[#allocation4 + $0x50] sm:$0xf0]  ;;  %v1818_v33 = vor.u32 %v1498_v24, %v1356_v23 }
  0x33   :  { %328 = vmatpush.bf16.msra.mxu2 %v1788_v1  ;;  %341 = vmatpush.bf16.msra.mxu3 %v1796_v10  ;;  %v1364_v31 = vld [vmem:[#allocation4 + $0x48] sm:$0xf]  ;;  %v1499_v32 = vld [vmem:[#allocation4 + $0x54] sm:$0xf0]  ;;  %v1820_v34 = vor.u32 %v1501_v28, %v1382_v29  ;;  %v1340_v36 = vld [vmem:[#allocation4 + $0x20] sm:$0xf]  ;;  %v1824_v38 = vor.u32 %v1496_v27, %v1358_v30 }
  0x34   :  { %v1494_v37 = vld [vmem:[#allocation4 + $0x2c] sm:$0xf0]  ;;  %v1826_v41 = vor.u32 %v1499_v32, %v1364_v31  ;;  %v1492_v42 = vld [vmem:[#allocation4 + $0x24] sm:$0xf]  ;;  %v1497_v43 = vld [vmem:[#allocation4 + $0x4c] sm:$0xf] }
  0x35   :  { %v1366_v45 = vld [vmem:[#allocation4 + $0x58] sm:$0xf0]  ;;  %v1342_v46 = vld [vmem:[#allocation4 + $0x30] sm:$0xf0]  ;;  %v1348_v47 = vld [vmem:[#allocation4 + $0x28] sm:$0xf]  ;;  %v1830_v51 = vor.u32 %v1494_v37, %v1340_v36 }
  0x36   :  { %303 = vmatpush.bf16.msra.mxu0 %v1794_v9  ;;  %316 = vmatpush.bf16.msra.mxu1 %v1800_v13  ;;  %v1495_v50 = vld [vmem:[#allocation4 + $0x34] sm:$0xf0]  ;;  %v1832_v52 = vor.u32 %v1497_v43, %v1366_v45  ;;  %v1324_v54 = vld [vmem:[#allocation4] sm:$0xf]  ;;  %v1490_v55 = vld [vmem:[#allocation4 + $0xc] sm:$0xf0]  ;;  %v1836_v56 = vor.u32 %v1492_v42, %v1342_v46 }
  0x37   :  { %329 = vmatpush.bf16.msra.mxu2 %v1802_v14  ;;  %342 = vmatpush.bf16.msra.mxu3 %v1808_v22  ;;  %v1838_v57 = vor.u32 %v1495_v50, %v1348_v47  ;;  %v1488_v58 = vld [vmem:[#allocation4 + $0x4] sm:$0xf]  ;;  %v1493_v59 = vld [vmem:[#allocation4 + $0x2c] sm:$0xf]  ;;  %v1350_v61 = vld [vmem:[#allocation4 + $0x38] sm:$0xf0]  ;;  %v1842_v4 = vor.u32 %v1490_v55, %v1324_v54 }
  0x38   :  { %v1326_v62 = vld [vmem:[#allocation4 + $0x10] sm:$0xf0]  ;;  %v1332_v63 = vld [vmem:[#allocation4 + $0x8] sm:$0xf]  ;;  %v1491_v3 = vld [vmem:[#allocation4 + $0x14] sm:$0xf0]  ;;  %v1844_v5 = vor.u32 %v1493_v59, %v1350_v61 }
  0x39   :  { %v1848_v6 = vor.u32 %v1488_v58, %v1326_v62  ;;  %v1850_v7 = vor.u32 %v1491_v3, %v1332_v63  ;;  %v1489_v8 = vld [vmem:[#allocation4 + $0xc] sm:$0xf]  ;;  %v1334_v11 = vld [vmem:[#allocation4 + $0x18] sm:$0xf0]  ;;  %v1651_v15 = vmov 0.0|0.0   ;;  %v133_v16 = vld [vmem:[%s2162_s0] sm:$0xff] }
  0x3a   :  { %304 = vmatpush.bf16.msra.mxu0 %v1806_v21  ;;  %317 = vmatpush.bf16.msra.mxu1 %v1812_v25  ;;  %v1856_v12 = vor.u32 %v1489_v8, %v1334_v11  ;;  %v135_v17 = vunpack.c.l.bf16 %v133_v16  ;;  %v136_v18 = vunpack.c.h.bf16 %v133_v16  ;;  %v134_v24 = vld [vmem:[%s2162_s0 + $0x8] sm:$0xff] }
  0x3b   :  { %330 = vmatpush.bf16.msra.mxu2 %v1814_v26  ;;  %343 = vmatpush.bf16.msra.mxu3 %v1820_v34  ;;  %v137_v30 = vunpack.c.l.bf16 %v134_v24  ;;  %v138_v54 = vunpack.c.h.bf16 %v134_v24 }
  0x3e   :  { %305 = vmatpush.bf16.msra.mxu0 %v1818_v33  ;;  %318 = vmatpush.bf16.msra.mxu1 %v1824_v38 }
  0x3f   :  { %331 = vmatpush.bf16.msra.mxu2 %v1826_v41  ;;  %344 = vmatpush.bf16.msra.mxu3 %v1832_v52 }
  0x42   :  { %306 = vmatpush.bf16.msra.mxu0 %v1830_v51  ;;  %319 = vmatpush.bf16.msra.mxu1 %v1836_v56 }
  0x43   :  { %332 = vmatpush.bf16.msra.mxu2 %v1838_v57  ;;  %345 = vmatpush.bf16.msra.mxu3 %v1844_v5 }
  0x46   :  { %307 = vmatpush.bf16.msra.mxu0 %v1842_v4  ;;  %320 = vmatpush.bf16.msra.mxu1 %v1848_v6 }
  0x47   :  { %333 = vmatpush.bf16.msra.mxu2 %v1850_v7  ;;  %346 = vmatpush.bf16.msra.mxu3 %v1856_v12 }
  0x49   :  { %308 = vmatmul.bf16.vlgmr.msra.gmra.mxu0 %v1651_v15  ;;  %321 = vmatmul.bf16.vlgmr.msra.gmra.mxu1 %v1651_v15 }
  0x4a   :  { %427 = vmatpush.bf16.msrb.mxu0 %v1763_v35  ;;  %440 = vmatpush.bf16.msrb.mxu1 %v1765_v39 }
  0x4b   :  { %453 = vmatpush.bf16.msrb.mxu2 %v1767_v40  ;;  %466 = vmatpush.bf16.msrb.mxu3 %v1778_v53 }
  0x4c   :  { %334 = vmatmul.bf16.vlgmr.msra.gmra.mxu2 %v1651_v15  ;;  %347 = vmatmul.bf16.vlgmr.msra.gmra.mxu3 %v1651_v15 }
  0x4e   :  { %428 = vmatpush.bf16.msrb.mxu0 %v1770_v44  ;;  %441 = vmatpush.bf16.msrb.mxu1 %v1774_v48 }
  0x4f   :  { %454 = vmatpush.bf16.msrb.mxu2 %v1776_v49  ;;  %467 = vmatpush.bf16.msrb.mxu3 %v1790_v2 }
  0x52   :  { %429 = vmatpush.bf16.msrb.mxu0 %v1782_v60  ;;  %442 = vmatpush.bf16.msrb.mxu1 %v1786_v0 }
  0x53   :  { %455 = vmatpush.bf16.msrb.mxu2 %v1788_v1  ;;  %468 = vmatpush.bf16.msrb.mxu3 %v1796_v10 }
  0x56   :  { %430 = vmatpush.bf16.msrb.mxu0 %v1794_v9  ;;  %443 = vmatpush.bf16.msrb.mxu1 %v1800_v13 }
  0x57   :  { %456 = vmatpush.bf16.msrb.mxu2 %v1802_v14  ;;  %469 = vmatpush.bf16.msrb.mxu3 %v1808_v22 }
  0x5a   :  { %431 = vmatpush.bf16.msrb.mxu0 %v1806_v21  ;;  %444 = vmatpush.bf16.msrb.mxu1 %v1812_v25 }
  0x5b   :  { %457 = vmatpush.bf16.msrb.mxu2 %v1814_v26  ;;  %470 = vmatpush.bf16.msrb.mxu3 %v1820_v34 }
  0x5e   :  { %432 = vmatpush.bf16.msrb.mxu0 %v1818_v33  ;;  %445 = vmatpush.bf16.msrb.mxu1 %v1824_v38 }
  0x5f   :  { %458 = vmatpush.bf16.msrb.mxu2 %v1826_v41  ;;  %471 = vmatpush.bf16.msrb.mxu3 %v1832_v52 }
  0x62   :  { %433 = vmatpush.bf16.msrb.mxu0 %v1830_v51  ;;  %446 = vmatpush.bf16.msrb.mxu1 %v1836_v56 }
  0x63   :  { %459 = vmatpush.bf16.msrb.mxu2 %v1838_v57  ;;  %472 = vmatpush.bf16.msrb.mxu3 %v1844_v5 }
  0x66   :  { %434 = vmatpush.bf16.msrb.mxu0 %v1842_v4  ;;  %447 = vmatpush.bf16.msrb.mxu1 %v1848_v6 }
  0x67   :  { %460 = vmatpush.bf16.msrb.mxu2 %v1850_v7  ;;  %473 = vmatpush.bf16.msrb.mxu3 %v1856_v12 }
  0x6a   :  { %554 = vmatpush.bf16.msra.mxu0 %v1763_v35  ;;  %567 = vmatpush.bf16.msra.mxu1 %v1765_v39 }
  0x6b   :  { %580 = vmatpush.bf16.msra.mxu2 %v1767_v40  ;;  %593 = vmatpush.bf16.msra.mxu3 %v1778_v53 }
  0x6e   :  { %555 = vmatpush.bf16.msra.mxu0 %v1770_v44  ;;  %568 = vmatpush.bf16.msra.mxu1 %v1774_v48 }
  0x6f   :  { %581 = vmatpush.bf16.msra.mxu2 %v1776_v49  ;;  %594 = vmatpush.bf16.msra.mxu3 %v1790_v2 }
  0x72   :  { %556 = vmatpush.bf16.msra.mxu0 %v1782_v60  ;;  %569 = vmatpush.bf16.msra.mxu1 %v1786_v0 }
  0x73   :  { %582 = vmatpush.bf16.msra.mxu2 %v1788_v1  ;;  %595 = vmatpush.bf16.msra.mxu3 %v1796_v10 }
  0x76   :  { %557 = vmatpush.bf16.msra.mxu0 %v1794_v9  ;;  %570 = vmatpush.bf16.msra.mxu1 %v1800_v13 }
  0x77   :  { %583 = vmatpush.bf16.msra.mxu2 %v1802_v14  ;;  %596 = vmatpush.bf16.msra.mxu3 %v1808_v22 }
  0x7a   :  { %558 = vmatpush.bf16.msra.mxu0 %v1806_v21  ;;  %571 = vmatpush.bf16.msra.mxu1 %v1812_v25 }
  0x7b   :  { %584 = vmatpush.bf16.msra.mxu2 %v1814_v26  ;;  %597 = vmatpush.bf16.msra.mxu3 %v1820_v34 }
  0x7e   :  { %559 = vmatpush.bf16.msra.mxu0 %v1818_v33  ;;  %572 = vmatpush.bf16.msra.mxu1 %v1824_v38 }
  0x7f   :  { %585 = vmatpush.bf16.msra.mxu2 %v1826_v41  ;;  %598 = vmatpush.bf16.msra.mxu3 %v1832_v52 }
  0x82   :  { %560 = vmatpush.bf16.msra.mxu0 %v1830_v51  ;;  %573 = vmatpush.bf16.msra.mxu1 %v1836_v56 }
  0x83   :  { %586 = vmatpush.bf16.msra.mxu2 %v1838_v57  ;;  %599 = vmatpush.bf16.msra.mxu3 %v1844_v5 }
  0x86   :  { %561 = vmatpush.bf16.msra.mxu0 %v1842_v4  ;;  %574 = vmatpush.bf16.msra.mxu1 %v1848_v6 }
  0x87   :  { %587 = vmatpush.bf16.msra.mxu2 %v1850_v7  ;;  %600 = vmatpush.bf16.msra.mxu3 %v1856_v12 }
  0xc6   :  { %v309_v19 = vpop.f32.mrf.mxu0  ;;  %v322_v23 = vpop.f32.mrf.mxu1 }
  0xc7   :  { %v352_v20 = vadd.f32 %v309_v19, %v135_v17  ;;  %v353_v27 = vadd.f32 %v322_v23, %v136_v18 }
  0xc9   :  { %v1450_v28 = vmul.f32 -1.442695, %v352_v20  ;;  %v1451_v29 = vmul.f32 -1.442695, %v353_v27 }
  0xcb   :  { %1521 = vpow2.f32 %v1450_v28 }
  0xcc   :  { %1523 = vpow2.f32 %v1451_v29 }
  0xce   :  { %v311_v36 = vpop.f32.mrf.mxu0  ;;  %v324_v37 = vpop.f32.mrf.mxu1 }
  0xcf   :  { %v335_v31 = vpop.f32.mrf.mxu2  ;;  %v348_v45 = vpop.f32.mrf.mxu3 }
  0xd0   :  { %v354_v32 = vadd.f32 %v335_v31, %v137_v30  ;;  %v355_v59 = vadd.f32 %v348_v45, %v138_v54 }
  0xd1   :  { %v1522_v43 = vpop.eup %1521 }
  0xd2   :  { %v1452_v42 = vmul.f32 -1.442695, %v354_v32  ;;  %v1524_v46 = vpop.eup %1523  ;;  %v365_v47 = vadd.f32 1.0, %v1522_v43 }
  0xd3   :  { %v366_v50 = vadd.f32 1.0, %v1524_v46 }
  0xd4   :  { %1525 = vpow2.f32 %v1452_v42  ;;  %v379_v17 = vand.u32 2147483648, %v365_v47  ;;  %v377_v20 = vand.u32 2147483647, %v365_v47  ;;  %vm373_vm2 = vweird.f32 %v365_v47 }
  0xd5   :  { %1527 = vrcp.f32 %v365_v47  ;;  %v394_v18 = vand.u32 2147483648, %v366_v50  ;;  %v392_v24 = vand.u32 2147483647, %v366_v50  ;;  %vm388_vm3 = vweird.f32 %v366_v50 }
  0xd6   :  { %1529 = vrcp.f32 %v366_v50  ;;  %v380_v31 = vor.u32 1.1754944e-38, %v379_v17  ;;  %vm378_vm5 = vcmp.eq.f32.partialorder %v377_v20, 8.507059e+37 }
  0xd7   :  { %v337_v55 = vpop.f32.mrf.mxu2  ;;  %v350_v62 = vpop.f32.mrf.mxu3  ;;  %v395_v36 = vor.u32 1.1754944e-38, %v394_v18  ;;  %vm393_vm7 = vcmp.eq.f32.partialorder %v392_v24, 8.507059e+37 }
  0xda   :  { %v1526_v58 = vpop.eup %1525 }
  0xdb   :  { %v367_v61 = vadd.f32 1.0, %v1526_v58  ;;  %v1528_v63 = vpop.eup %1527 }
  0xdc   :  { %v1530_v3 = vpop.eup %1529  ;;  %v369_v8 = vmul.f32 %v1528_v63, %v365_v47  ;;  %vm374_vm0 = vweird.f32 %v1528_v63 }
  0xdd   :  { %1531 = vrcp.f32 %v367_v61  ;;  %v384_v11 = vmul.f32 %v1530_v3, %v366_v50  ;;  %vm389_vm1 = vweird.f32 %v1530_v3  ;;  %vm375_vm4 = vmor %vm373_vm2, %vm374_vm0  ;;  %v409_v50 = vand.u32 2147483648, %v367_v61 }
  0xde   :  { %1533 = vtanh.f32 %v355_v59  ;;  %v370_v15 = vsub.f32 1.0, %v369_v8  ;;  %vm390_vm6 = vmor %vm388_vm3, %vm389_vm1  ;;  %vm403_vm9 = vweird.f32 %v367_v61  ;;  %v407_v62 = vand.u32 2147483647, %v367_v61 }
  0xdf   :  { %v385_v16 = vsub.f32 1.0, %v384_v11  ;;  %v410_v8 = vor.u32 1.1754944e-38, %v409_v50 }
  0xe0   :  { %v371_v19 = vmul.f32 %v1528_v63, %v370_v15  ;;  %vm408_vm11 = vcmp.eq.f32.partialorder %v407_v62, 8.507059e+37 }
  0xe1   :  { %v386_v23 = vmul.f32 %v1530_v3, %v385_v16 }
  0xe2   :  { %v372_v28 = vadd.f32 %v1528_v63, %v371_v19 }
  0xe3   :  { %v1532_v27 = vpop.eup %1531  ;;  %v387_v32 = vadd.f32 %v1530_v3, %v386_v23 }
  0xe4   :  { %v1534_v29 = vpop.eup %1533  ;;  %v399_v30 = vmul.f32 %v1532_v27, %v367_v61  ;;  %v376_v37 = vsel %vm375_vm4, %v1528_v63, %v372_v28  ;;  %vm404_vm8 = vweird.f32 %v1532_v27  ;;  %v1453_v61 = vld [vmem:[%s2162_s0 + $0x10] sm:$0xff] }
  0xe5   :  { %v381_v43 = vsel %vm378_vm5, %v380_v31, %v376_v37  ;;  %v391_v45 = vsel %vm390_vm6, %v1530_v3, %v387_v32  ;;  %vm405_vm10 = vmor %vm403_vm9, %vm404_vm8  ;;  %v422_v17 = vunpack.c.l.bf16 %v1453_v61  ;;  %v423_v18 = vunpack.c.h.bf16 %v1453_v61 }
  0xe6   :  { %v400_v42 = vsub.f32 1.0, %v399_v30  ;;  %v396_v46 = vsel %vm393_vm7, %v395_v36, %v391_v45  ;;  %v415_v54 = vmul.f32 %v1534_v29, %v381_v43 }
  0xe7   :  { %v414_v55 = vmul.f32 0.0, %v396_v46 }
  0xe8   :  { %v401_v58 = vmul.f32 %v1532_v27, %v400_v42 }
  0xe9   :  { %v1929_v59 = vadd.f32 %v415_v54, %v414_v55 }
  0xea   :  { %v402_v47 = vadd.f32 %v1532_v27, %v401_v58 }
  0xeb   :  { %1535 = vtanh.f32 %v1929_v59 }
  0xec   :  { %v406_v63 = vsel %vm405_vm10, %v1532_v27, %v402_v47  ;;  %v1454_v27 = vld [vmem:[%s2162_s0 + $0x18] sm:$0xff] }
  0xed   :  { %v411_v3 = vsel %vm408_vm11, %v410_v8, %v406_v63  ;;  %v424_v30 = vunpack.c.l.bf16 %v1454_v27  ;;  %v425_v50 = vunpack.c.h.bf16 %v1454_v27 }
  0xf1   :  { %v1536_v11 = vpop.eup %1535 }
  0xf2   :  { %v418_v15 = vmul.f32 %v1536_v11, %v411_v3 }
  0xf4   :  { %v426_v16 = vpack.c.bf16 %v418_v15, %v418_v15 }
  0xf6   :  { %435 = vmatmul.bf16.vlgmr.msrb.gmra.mxu0 %v426_v16  ;;  %448 = vmatmul.bf16.vlgmr.msrb.gmra.mxu1 %v426_v16 }
  0xf7   :  { %461 = vmatmul.bf16.vlgmr.msrb.gmra.mxu2 %v426_v16  ;;  %474 = vmatmul.bf16.vlgmr.msrb.gmra.mxu3 %v426_v16 }
  0xf8   :  { %681 = vmatpush.bf16.msrb.mxu0 %v1763_v35  ;;  %694 = vmatpush.bf16.msrb.mxu1 %v1765_v39 }
  0xf9   :  { %707 = vmatpush.bf16.msrb.mxu2 %v1767_v40  ;;  %720 = vmatpush.bf16.msrb.mxu3 %v1778_v53 }
  0xfc   :  { %682 = vmatpush.bf16.msrb.mxu0 %v1770_v44  ;;  %695 = vmatpush.bf16.msrb.mxu1 %v1774_v48 }
  0xfd   :  { %708 = vmatpush.bf16.msrb.mxu2 %v1776_v49  ;;  %721 = vmatpush.bf16.msrb.mxu3 %v1790_v2 }
 0x100   :  { %683 = vmatpush.bf16.msrb.mxu0 %v1782_v60  ;;  %696 = vmatpush.bf16.msrb.mxu1 %v1786_v0 }
 0x101   :  { %709 = vmatpush.bf16.msrb.mxu2 %v1788_v1  ;;  %722 = vmatpush.bf16.msrb.mxu3 %v1796_v10 }
 0x104   :  { %684 = vmatpush.bf16.msrb.mxu0 %v1794_v9  ;;  %697 = vmatpush.bf16.msrb.mxu1 %v1800_v13 }
 0x105   :  { %710 = vmatpush.bf16.msrb.mxu2 %v1802_v14  ;;  %723 = vmatpush.bf16.msrb.mxu3 %v1808_v22 }
 0x108   :  { %685 = vmatpush.bf16.msrb.mxu0 %v1806_v21  ;;  %698 = vmatpush.bf16.msrb.mxu1 %v1812_v25 }
 0x109   :  { %711 = vmatpush.bf16.msrb.mxu2 %v1814_v26  ;;  %724 = vmatpush.bf16.msrb.mxu3 %v1820_v34 }
 0x10c   :  { %686 = vmatpush.bf16.msrb.mxu0 %v1818_v33  ;;  %699 = vmatpush.bf16.msrb.mxu1 %v1824_v38 }
 0x10d   :  { %712 = vmatpush.bf16.msrb.mxu2 %v1826_v41  ;;  %725 = vmatpush.bf16.msrb.mxu3 %v1832_v52 }
 0x110   :  { %687 = vmatpush.bf16.msrb.mxu0 %v1830_v51  ;;  %700 = vmatpush.bf16.msrb.mxu1 %v1836_v56 }
 0x111   :  { %713 = vmatpush.bf16.msrb.mxu2 %v1838_v57  ;;  %726 = vmatpush.bf16.msrb.mxu3 %v1844_v5 }
 0x114   :  { %688 = vmatpush.bf16.msrb.mxu0 %v1842_v4  ;;  %701 = vmatpush.bf16.msrb.mxu1 %v1848_v6 }
 0x115   :  { %714 = vmatpush.bf16.msrb.mxu2 %v1850_v7  ;;  %727 = vmatpush.bf16.msrb.mxu3 %v1856_v12 }
 0x173   :  { %v436_v19 = vpop.f32.mrf.mxu0  ;;  %v449_v20 = vpop.f32.mrf.mxu1 }
 0x174   :  { %v479_v23 = vadd.f32 %v436_v19, %v422_v17  ;;  %v480_v24 = vadd.f32 %v449_v20, %v423_v18 }
 0x176   :  { %v1455_v28 = vmul.f32 -1.442695, %v479_v23  ;;  %v1456_v29 = vmul.f32 -1.442695, %v480_v24 }
 0x178   :  { %1537 = vpow2.f32 %v1455_v28 }
 0x179   :  { %1539 = vpow2.f32 %v1456_v29 }
 0x17a   :  { %v462_v31 = vpop.f32.mrf.mxu2  ;;  %v475_v32 = vpop.f32.mrf.mxu3 }
 0x17b   :  { %v481_v36 = vadd.f32 %v462_v31, %v424_v30  ;;  %v438_v37 = vpop.f32.mrf.mxu0  ;;  %v451_v42 = vpop.f32.mrf.mxu1  ;;  %v482_v11 = vadd.f32 %v475_v32, %v425_v50 }
 0x17d   :  { %v1457_v43 = vmul.f32 -1.442695, %v481_v36 }
 0x17e   :  { %v1538_v45 = vpop.eup %1537 }
 0x17f   :  { %v1540_v46 = vpop.eup %1539  ;;  %v492_v54 = vadd.f32 1.0, %v1538_v45  ;;  %1541 = vpow2.f32 %v1457_v43 }
 0x180   :  { %v493_v55 = vadd.f32 1.0, %v1540_v46 }
 0x181   :  { %1543 = vrcp.f32 %v492_v54  ;;  %v506_v18 = vand.u32 2147483648, %v492_v54  ;;  %v504_v23 = vand.u32 2147483647, %v492_v54  ;;  %vm500_vm14 = vweird.f32 %v492_v54 }
 0x182   :  { %1545 = vrcp.f32 %v493_v55  ;;  %v464_v58 = vpop.f32.mrf.mxu2  ;;  %v477_v47 = vpop.f32.mrf.mxu3  ;;  %v521_v19 = vand.u32 2147483648, %v493_v55  ;;  %v519_v28 = vand.u32 2147483647, %v493_v55  ;;  %vm515_vm15 = vweird.f32 %v493_v55 }
 0x183   :  { %v507_v31 = vor.u32 1.1754944e-38, %v506_v18  ;;  %vm505_vm2 = vcmp.eq.f32.partialorder %v504_v23, 8.507059e+37 }
 0x184   :  { %v522_v36 = vor.u32 1.1754944e-38, %v521_v19  ;;  %vm520_vm3 = vcmp.eq.f32.partialorder %v519_v28, 8.507059e+37 }
 0x185   :  { %v1542_v62 = vpop.eup %1541 }
 0x186   :  { %v494_v63 = vadd.f32 1.0, %v1542_v62 }
 0x187   :  { %v1544_v8 = vpop.eup %1543 }
 0x188   :  { %v1546_v3 = vpop.eup %1545  ;;  %v496_v15 = vmul.f32 %v1544_v8, %v492_v54  ;;  %1547 = vrcp.f32 %v494_v63  ;;  %vm501_vm12 = vweird.f32 %v1544_v8  ;;  %vm530_vm5 = vweird.f32 %v494_v63 }
 0x189   :  { %v511_v16 = vmul.f32 %v1546_v3, %v493_v55  ;;  %1549 = vtanh.f32 %v482_v11  ;;  %vm516_vm13 = vweird.f32 %v1546_v3  ;;  %vm502_vm0 = vmor %vm500_vm14, %vm501_vm12  ;;  %v536_v11 = vand.u32 2147483648, %v494_v63 }
 0x18a   :  { %v497_v61 = vsub.f32 1.0, %v496_v15  ;;  %vm517_vm1 = vmor %vm515_vm15, %vm516_vm13 }
 0x18b   :  { %v512_v17 = vsub.f32 1.0, %v511_v16  ;;  %v537_v16 = vor.u32 1.1754944e-38, %v536_v11 }
 0x18c   :  { %v498_v20 = vmul.f32 %v1544_v8, %v497_v61 }
 0x18d   :  { %v513_v24 = vmul.f32 %v1546_v3, %v512_v17 }
 0x18e   :  { %v1548_v27 = vpop.eup %1547  ;;  %v499_v29 = vadd.f32 %v1544_v8, %v498_v20 }
 0x18f   :  { %v526_v30 = vmul.f32 %v1548_v27, %v494_v63  ;;  %v514_v32 = vadd.f32 %v1546_v3, %v513_v24  ;;  %v1550_v42 = vpop.eup %1549  ;;  %vm531_vm4 = vweird.f32 %v1548_v27 }
 0x190   :  { %v503_v37 = vsel %vm502_vm0, %v1544_v8, %v499_v29  ;;  %v534_v8 = vand.u32 2147483647, %v494_v63  ;;  %vm532_vm6 = vmor %vm530_vm5, %vm531_vm4 }
 0x191   :  { %v527_v43 = vsub.f32 1.0, %v526_v30  ;;  %v508_v45 = vsel %vm505_vm2, %v507_v31, %v503_v37  ;;  %v518_v46 = vsel %vm517_vm1, %v1546_v3, %v514_v32 }
 0x192   :  { %v523_v58 = vsel %vm520_vm3, %v522_v36, %v518_v46  ;;  %v542_v47 = vmul.f32 %v1550_v42, %v508_v45  ;;  %vm535_vm7 = vcmp.eq.f32.partialorder %v534_v8, 8.507059e+37 }
 0x193   :  { %v541_v50 = vmul.f32 %v523_v58, %v1929_v59  ;;  %v528_v62 = vmul.f32 %v1548_v27, %v527_v43  ;;  %v1458_v59 = vld [vmem:[%s2162_s0 + $0x20] sm:$0xff] }
 0x194   :  { %v549_v63 = vunpack.c.l.bf16 %v1458_v59  ;;  %v550_v19 = vunpack.c.h.bf16 %v1458_v59 }
 0x195   :  { %v1971_v54 = vadd.f32 %v542_v47, %v541_v50  ;;  %v529_v55 = vadd.f32 %v1548_v27, %v528_v62 }
 0x197   :  { %1551 = vtanh.f32 %v1971_v54  ;;  %v533_v15 = vsel %vm532_vm6, %v1548_v27, %v529_v55  ;;  %v1459_v27 = vld [vmem:[%s2162_s0 + $0x28] sm:$0xff] }
 0x198   :  { %v538_v61 = vsel %vm535_vm7, %v537_v16, %v533_v15  ;;  %v551_v31 = vunpack.c.l.bf16 %v1459_v27  ;;  %v552_v11 = vunpack.c.h.bf16 %v1459_v27 }
 0x19d   :  { %v1552_v3 = vpop.eup %1551 }
 0x19e   :  { %v545_v17 = vmul.f32 %v1552_v3, %v538_v61 }
 0x1a0   :  { %v553_v18 = vpack.c.bf16 %v545_v17, %v545_v17 }
 0x1a2   :  { %562 = vmatmul.bf16.vlgmr.msra.gmra.mxu0 %v553_v18  ;;  %575 = vmatmul.bf16.vlgmr.msra.gmra.mxu1 %v553_v18 }
 0x1a3   :  { %588 = vmatmul.bf16.vlgmr.msra.gmra.mxu2 %v553_v18  ;;  %601 = vmatmul.bf16.vlgmr.msra.gmra.mxu3 %v553_v18 }
 0x1a4   :  { %808 = vmatpush.bf16.msra.mxu0 %v1763_v35  ;;  %821 = vmatpush.bf16.msra.mxu1 %v1765_v39 }
 0x1a5   :  { %834 = vmatpush.bf16.msra.mxu2 %v1767_v40  ;;  %847 = vmatpush.bf16.msra.mxu3 %v1778_v53 }
 0x1a8   :  { %809 = vmatpush.bf16.msra.mxu0 %v1770_v44  ;;  %822 = vmatpush.bf16.msra.mxu1 %v1774_v48 }
 0x1a9   :  { %835 = vmatpush.bf16.msra.mxu2 %v1776_v49  ;;  %848 = vmatpush.bf16.msra.mxu3 %v1790_v2 }
 0x1ac   :  { %810 = vmatpush.bf16.msra.mxu0 %v1782_v60  ;;  %823 = vmatpush.bf16.msra.mxu1 %v1786_v0 }
 0x1ad   :  { %836 = vmatpush.bf16.msra.mxu2 %v1788_v1  ;;  %849 = vmatpush.bf16.msra.mxu3 %v1796_v10 }
 0x1b0   :  { %811 = vmatpush.bf16.msra.mxu0 %v1794_v9  ;;  %824 = vmatpush.bf16.msra.mxu1 %v1800_v13 }
 0x1b1   :  { %837 = vmatpush.bf16.msra.mxu2 %v1802_v14  ;;  %850 = vmatpush.bf16.msra.mxu3 %v1808_v22 }
 0x1b4   :  { %812 = vmatpush.bf16.msra.mxu0 %v1806_v21  ;;  %825 = vmatpush.bf16.msra.mxu1 %v1812_v25 }
 0x1b5   :  { %838 = vmatpush.bf16.msra.mxu2 %v1814_v26  ;;  %851 = vmatpush.bf16.msra.mxu3 %v1820_v34 }
 0x1b8   :  { %813 = vmatpush.bf16.msra.mxu0 %v1818_v33  ;;  %826 = vmatpush.bf16.msra.mxu1 %v1824_v38 }
 0x1b9   :  { %839 = vmatpush.bf16.msra.mxu2 %v1826_v41  ;;  %852 = vmatpush.bf16.msra.mxu3 %v1832_v52 }
 0x1bc   :  { %814 = vmatpush.bf16.msra.mxu0 %v1830_v51  ;;  %827 = vmatpush.bf16.msra.mxu1 %v1836_v56 }
 0x1bd   :  { %840 = vmatpush.bf16.msra.mxu2 %v1838_v57  ;;  %853 = vmatpush.bf16.msra.mxu3 %v1844_v5 }
 0x1c0   :  { %815 = vmatpush.bf16.msra.mxu0 %v1842_v4  ;;  %828 = vmatpush.bf16.msra.mxu1 %v1848_v6 }
 0x1c1   :  { %841 = vmatpush.bf16.msra.mxu2 %v1850_v7  ;;  %854 = vmatpush.bf16.msra.mxu3 %v1856_v12 }
 0x21f   :  { %v563_v20 = vpop.f32.mrf.mxu0  ;;  %v576_v23 = vpop.f32.mrf.mxu1 }
 0x220   :  { %v606_v24 = vadd.f32 %v563_v20, %v549_v63  ;;  %v607_v28 = vadd.f32 %v576_v23, %v550_v19 }
 0x222   :  { %v1460_v29 = vmul.f32 -1.442695, %v606_v24  ;;  %v1461_v30 = vmul.f32 -1.442695, %v607_v28 }
 0x224   :  { %1553 = vpow2.f32 %v1460_v29 }
 0x225   :  { %1555 = vpow2.f32 %v1461_v30 }
 0x226   :  { %v589_v32 = vpop.f32.mrf.mxu2  ;;  %v602_v36 = vpop.f32.mrf.mxu3 }
 0x227   :  { %v608_v37 = vadd.f32 %v589_v32, %v551_v31  ;;  %v565_v42 = vpop.f32.mrf.mxu0  ;;  %v578_v43 = vpop.f32.mrf.mxu1  ;;  %v609_v3 = vadd.f32 %v602_v36, %v552_v11 }
 0x229   :  { %v1462_v45 = vmul.f32 -1.442695, %v608_v37 }
 0x22a   :  { %v1554_v46 = vpop.eup %1553 }
 0x22b   :  { %v1556_v58 = vpop.eup %1555  ;;  %v619_v47 = vadd.f32 1.0, %v1554_v46  ;;  %1557 = vpow2.f32 %v1462_v45 }
 0x22c   :  { %v620_v50 = vadd.f32 1.0, %v1556_v58 }
 0x22d   :  { %1559 = vrcp.f32 %v619_v47  ;;  %v633_v19 = vand.u32 2147483648, %v619_v47  ;;  %v631_v24 = vand.u32 2147483647, %v619_v47  ;;  %vm627_vm10 = vweird.f32 %v619_v47 }
 0x22e   :  { %1561 = vrcp.f32 %v620_v50  ;;  %v591_v62 = vpop.f32.mrf.mxu2  ;;  %v604_v55 = vpop.f32.mrf.mxu3  ;;  %v648_v20 = vand.u32 2147483648, %v620_v50  ;;  %v646_v29 = vand.u32 2147483647, %v620_v50  ;;  %vm642_vm11 = vweird.f32 %v620_v50 }
 0x22f   :  { %v634_v32 = vor.u32 1.1754944e-38, %v633_v19  ;;  %vm632_vm14 = vcmp.eq.f32.partialorder %v631_v24, 8.507059e+37 }
 0x230   :  { %v649_v37 = vor.u32 1.1754944e-38, %v648_v20  ;;  %vm647_vm15 = vcmp.eq.f32.partialorder %v646_v29, 8.507059e+37 }
 0x231   :  { %v1558_v8 = vpop.eup %1557 }
 0x232   :  { %v621_v15 = vadd.f32 1.0, %v1558_v8 }
 0x233   :  { %v1560_v16 = vpop.eup %1559 }
 0x234   :  { %v1562_v61 = vpop.eup %1561  ;;  %v623_v17 = vmul.f32 %v1560_v16, %v619_v47  ;;  %1563 = vrcp.f32 %v621_v15  ;;  %vm628_vm8 = vweird.f32 %v1560_v16  ;;  %vm657_vm1 = vweird.f32 %v621_v15 }
 0x235   :  { %v638_v18 = vmul.f32 %v1562_v61, %v620_v50  ;;  %1565 = vtanh.f32 %v609_v3  ;;  %vm643_vm9 = vweird.f32 %v1562_v61  ;;  %vm629_vm12 = vmor %vm627_vm10, %vm628_vm8  ;;  %v663_v3 = vand.u32 2147483648, %v621_v15 }
 0x236   :  { %v624_v59 = vsub.f32 1.0, %v623_v17  ;;  %vm644_vm13 = vmor %vm642_vm11, %vm643_vm9 }
 0x237   :  { %v639_v63 = vsub.f32 1.0, %v638_v18  ;;  %v664_v18 = vor.u32 1.1754944e-38, %v663_v3 }
 0x238   :  { %v625_v23 = vmul.f32 %v1560_v16, %v624_v59 }
 0x239   :  { %v640_v28 = vmul.f32 %v1562_v61, %v639_v63 }
 0x23a   :  { %v1564_v27 = vpop.eup %1563  ;;  %v626_v30 = vadd.f32 %v1560_v16, %v625_v23 }
 0x23b   :  { %v653_v31 = vmul.f32 %v1564_v27, %v621_v15  ;;  %v641_v36 = vadd.f32 %v1562_v61, %v640_v28  ;;  %v1566_v43 = vpop.eup %1565  ;;  %vm658_vm0 = vweird.f32 %v1564_v27 }
 0x23c   :  { %v630_v42 = vsel %vm629_vm12, %v1560_v16, %v626_v30  ;;  %v661_v16 = vand.u32 2147483647, %v621_v15  ;;  %vm659_vm2 = vmor %vm657_vm1, %vm658_vm0 }
 0x23d   :  { %v654_v45 = vsub.f32 1.0, %v653_v31  ;;  %v635_v46 = vsel %vm632_vm14, %v634_v32, %v630_v42  ;;  %v645_v58 = vsel %vm644_vm13, %v1562_v61, %v641_v36 }
 0x23e   :  { %v650_v62 = vsel %vm647_vm15, %v649_v37, %v645_v58  ;;  %v669_v55 = vmul.f32 %v1566_v43, %v635_v46  ;;  %vm662_vm3 = vcmp.eq.f32.partialorder %v661_v16, 8.507059e+37 }
 0x23f   :  { %v668_v11 = vmul.f32 %v650_v62, %v1971_v54  ;;  %v655_v8 = vmul.f32 %v1564_v27, %v654_v45  ;;  %v1463_v54 = vld [vmem:[%s2162_s0 + $0x30] sm:$0xff] }
 0x240   :  { %v676_v15 = vunpack.c.l.bf16 %v1463_v54  ;;  %v677_v20 = vunpack.c.h.bf16 %v1463_v54 }
 0x241   :  { %v2013_v47 = vadd.f32 %v669_v55, %v668_v11  ;;  %v656_v50 = vadd.f32 %v1564_v27, %v655_v8 }
 0x243   :  { %1567 = vtanh.f32 %v2013_v47  ;;  %v660_v17 = vsel %vm659_vm2, %v1564_v27, %v656_v50  ;;  %v1464_v27 = vld [vmem:[%s2162_s0 + $0x38] sm:$0xff] }
 0x244   :  { %v665_v59 = vsel %vm662_vm3, %v664_v18, %v660_v17  ;;  %v678_v32 = vunpack.c.l.bf16 %v1464_v27  ;;  %v679_v3 = vunpack.c.h.bf16 %v1464_v27 }
 0x249   :  { %v1568_v61 = vpop.eup %1567 }
 0x24a   :  { %v672_v63 = vmul.f32 %v1568_v61, %v665_v59 }
 0x24c   :  { %v680_v19 = vpack.c.bf16 %v672_v63, %v672_v63 }
 0x24e   :  { %689 = vmatmul.bf16.vlgmr.msrb.gmra.mxu0 %v680_v19  ;;  %702 = vmatmul.bf16.vlgmr.msrb.gmra.mxu1 %v680_v19 }
 0x24f   :  { %715 = vmatmul.bf16.vlgmr.msrb.gmra.mxu2 %v680_v19  ;;  %728 = vmatmul.bf16.vlgmr.msrb.gmra.mxu3 %v680_v19 }
 0x250   :  { %935 = vmatpush.bf16.msrb.mxu0 %v1763_v35  ;;  %948 = vmatpush.bf16.msrb.mxu1 %v1765_v39 }
 0x251   :  { %961 = vmatpush.bf16.msrb.mxu2 %v1767_v40  ;;  %974 = vmatpush.bf16.msrb.mxu3 %v1778_v53 }
 0x254   :  { %936 = vmatpush.bf16.msrb.mxu0 %v1770_v44  ;;  %949 = vmatpush.bf16.msrb.mxu1 %v1774_v48 }
 0x255   :  { %962 = vmatpush.bf16.msrb.mxu2 %v1776_v49  ;;  %975 = vmatpush.bf16.msrb.mxu3 %v1790_v2 }
 0x258   :  { %937 = vmatpush.bf16.msrb.mxu0 %v1782_v60  ;;  %950 = vmatpush.bf16.msrb.mxu1 %v1786_v0 }
 0x259   :  { %963 = vmatpush.bf16.msrb.mxu2 %v1788_v1  ;;  %976 = vmatpush.bf16.msrb.mxu3 %v1796_v10 }
 0x25c   :  { %938 = vmatpush.bf16.msrb.mxu0 %v1794_v9  ;;  %951 = vmatpush.bf16.msrb.mxu1 %v1800_v13 }
 0x25d   :  { %964 = vmatpush.bf16.msrb.mxu2 %v1802_v14  ;;  %977 = vmatpush.bf16.msrb.mxu3 %v1808_v22 }
 0x260   :  { %939 = vmatpush.bf16.msrb.mxu0 %v1806_v21  ;;  %952 = vmatpush.bf16.msrb.mxu1 %v1812_v25 }
 0x261   :  { %965 = vmatpush.bf16.msrb.mxu2 %v1814_v26  ;;  %978 = vmatpush.bf16.msrb.mxu3 %v1820_v34 }
 0x264   :  { %940 = vmatpush.bf16.msrb.mxu0 %v1818_v33  ;;  %953 = vmatpush.bf16.msrb.mxu1 %v1824_v38 }
 0x265   :  { %966 = vmatpush.bf16.msrb.mxu2 %v1826_v41  ;;  %979 = vmatpush.bf16.msrb.mxu3 %v1832_v52 }
 0x268   :  { %941 = vmatpush.bf16.msrb.mxu0 %v1830_v51  ;;  %954 = vmatpush.bf16.msrb.mxu1 %v1836_v56 }
 0x269   :  { %967 = vmatpush.bf16.msrb.mxu2 %v1838_v57  ;;  %980 = vmatpush.bf16.msrb.mxu3 %v1844_v5 }
 0x26c   :  { %942 = vmatpush.bf16.msrb.mxu0 %v1842_v4  ;;  %955 = vmatpush.bf16.msrb.mxu1 %v1848_v6 }
 0x26d   :  { %968 = vmatpush.bf16.msrb.mxu2 %v1850_v7  ;;  %981 = vmatpush.bf16.msrb.mxu3 %v1856_v12 }
 0x2cb   :  { %v690_v23 = vpop.f32.mrf.mxu0  ;;  %v703_v24 = vpop.f32.mrf.mxu1 }
 0x2cc   :  { %v733_v28 = vadd.f32 %v690_v23, %v676_v15  ;;  %v734_v29 = vadd.f32 %v703_v24, %v677_v20 }
 0x2ce   :  { %v1465_v30 = vmul.f32 -1.442695, %v733_v28  ;;  %v1466_v31 = vmul.f32 -1.442695, %v734_v29 }
 0x2d0   :  { %1569 = vpow2.f32 %v1465_v30 }
 0x2d1   :  { %1571 = vpow2.f32 %v1466_v31 }
 0x2d2   :  { %v716_v36 = vpop.f32.mrf.mxu2  ;;  %v729_v37 = vpop.f32.mrf.mxu3 }
 0x2d3   :  { %v735_v42 = vadd.f32 %v716_v36, %v678_v32  ;;  %v692_v43 = vpop.f32.mrf.mxu0  ;;  %v705_v45 = vpop.f32.mrf.mxu1  ;;  %v736_v61 = vadd.f32 %v729_v37, %v679_v3 }
 0x2d5   :  { %v1467_v46 = vmul.f32 -1.442695, %v735_v42 }
 0x2d6   :  { %v1570_v58 = vpop.eup %1569 }
 0x2d7   :  { %v1572_v62 = vpop.eup %1571  ;;  %v746_v55 = vadd.f32 1.0, %v1570_v58  ;;  %1573 = vpow2.f32 %v1467_v46 }
 0x2d8   :  { %v747_v11 = vadd.f32 1.0, %v1572_v62 }
 0x2d9   :  { %1575 = vrcp.f32 %v746_v55  ;;  %v760_v20 = vand.u32 2147483648, %v746_v55  ;;  %v758_v28 = vand.u32 2147483647, %v746_v55  ;;  %vm754_vm6 = vweird.f32 %v746_v55 }
 0x2da   :  { %1577 = vrcp.f32 %v747_v11  ;;  %v718_v8 = vpop.f32.mrf.mxu2  ;;  %v731_v50 = vpop.f32.mrf.mxu3  ;;  %v775_v23 = vand.u32 2147483648, %v747_v11  ;;  %v773_v30 = vand.u32 2147483647, %v747_v11  ;;  %vm769_vm7 = vweird.f32 %v747_v11 }
 0x2db   :  { %v761_v36 = vor.u32 1.1754944e-38, %v760_v20  ;;  %vm759_vm10 = vcmp.eq.f32.partialorder %v758_v28, 8.507059e+37 }
 0x2dc   :  { %v776_v42 = vor.u32 1.1754944e-38, %v775_v23  ;;  %vm774_vm11 = vcmp.eq.f32.partialorder %v773_v30, 8.507059e+37 }
 0x2dd   :  { %v1574_v16 = vpop.eup %1573 }
 0x2de   :  { %v748_v17 = vadd.f32 1.0, %v1574_v16 }
 0x2df   :  { %v1576_v18 = vpop.eup %1575 }
 0x2e0   :  { %v1578_v59 = vpop.eup %1577  ;;  %v750_v63 = vmul.f32 %v1576_v18, %v746_v55  ;;  %1579 = vrcp.f32 %v748_v17  ;;  %vm755_vm4 = vweird.f32 %v1576_v18  ;;  %vm784_vm13 = vweird.f32 %v748_v17 }
 0x2e1   :  { %v765_v19 = vmul.f32 %v1578_v59, %v747_v11  ;;  %1581 = vtanh.f32 %v736_v61  ;;  %vm770_vm5 = vweird.f32 %v1578_v59  ;;  %vm756_vm8 = vmor %vm754_vm6, %vm755_vm4  ;;  %v790_v61 = vand.u32 2147483648, %v748_v17 }
 0x2e2   :  { %v751_v54 = vsub.f32 1.0, %v750_v63  ;;  %vm771_vm9 = vmor %vm769_vm7, %vm770_vm5 }
 0x2e3   :  { %v766_v15 = vsub.f32 1.0, %v765_v19  ;;  %v791_v19 = vor.u32 1.1754944e-38, %v790_v61 }
 0x2e4   :  { %v752_v24 = vmul.f32 %v1576_v18, %v751_v54 }
 0x2e5   :  { %v767_v29 = vmul.f32 %v1578_v59, %v766_v15 }
 0x2e6   :  { %v1580_v27 = vpop.eup %1579  ;;  %v753_v31 = vadd.f32 %v1576_v18, %v752_v24 }
 0x2e7   :  { %v780_v32 = vmul.f32 %v1580_v27, %v748_v17  ;;  %v768_v37 = vadd.f32 %v1578_v59, %v767_v29  ;;  %v1582_v45 = vpop.eup %1581  ;;  %vm785_vm12 = vweird.f32 %v1580_v27 }
 0x2e8   :  { %v757_v43 = vsel %vm756_vm8, %v1576_v18, %v753_v31  ;;  %v788_v18 = vand.u32 2147483647, %v748_v17  ;;  %vm786_vm14 = vmor %vm784_vm13, %vm785_vm12 }
 0x2e9   :  { %v781_v46 = vsub.f32 1.0, %v780_v32  ;;  %v762_v58 = vsel %vm759_vm10, %v761_v36, %v757_v43  ;;  %v772_v62 = vsel %vm771_vm9, %v1578_v59, %v768_v37 }
 0x2ea   :  { %v777_v8 = vsel %vm774_vm11, %v776_v42, %v772_v62  ;;  %v796_v50 = vmul.f32 %v1582_v45, %v762_v58  ;;  %vm789_vm15 = vcmp.eq.f32.partialorder %v788_v18, 8.507059e+37 }
 0x2eb   :  { %v795_v3 = vmul.f32 %v777_v8, %v2013_v47  ;;  %v782_v16 = vmul.f32 %v1580_v27, %v781_v46  ;;  %v1468_v47 = vld [vmem:[%s2162_s0 + $0x40] sm:$0xff] }
 0x2ec   :  { %v803_v17 = vunpack.c.l.bf16 %v1468_v47  ;;  %v804_v23 = vunpack.c.h.bf16 %v1468_v47 }
 0x2ed   :  { %v2055_v55 = vadd.f32 %v796_v50, %v795_v3  ;;  %v783_v11 = vadd.f32 %v1580_v27, %v782_v16 }
 0x2ef   :  { %1583 = vtanh.f32 %v2055_v55  ;;  %v787_v63 = vsel %vm786_vm14, %v1580_v27, %v783_v11  ;;  %v1469_v27 = vld [vmem:[%s2162_s0 + $0x48] sm:$0xff] }
 0x2f0   :  { %v792_v54 = vsel %vm789_vm15, %v791_v19, %v787_v63  ;;  %v805_v36 = vunpack.c.l.bf16 %v1469_v27  ;;  %v806_v61 = vunpack.c.h.bf16 %v1469_v27 }
 0x2f5   :  { %v1584_v59 = vpop.eup %1583 }
 0x2f6   :  { %v799_v15 = vmul.f32 %v1584_v59, %v792_v54 }
 0x2f8   :  { %v807_v20 = vpack.c.bf16 %v799_v15, %v799_v15 }
 0x2fa   :  { %816 = vmatmul.bf16.vlgmr.msra.gmra.mxu0 %v807_v20  ;;  %829 = vmatmul.bf16.vlgmr.msra.gmra.mxu1 %v807_v20 }
 0x2fb   :  { %842 = vmatmul.bf16.vlgmr.msra.gmra.mxu2 %v807_v20  ;;  %855 = vmatmul.bf16.vlgmr.msra.gmra.mxu3 %v807_v20 }
 0x2fc   :  { %1062 = vmatpush.bf16.msra.mxu0 %v1763_v35  ;;  %1075 = vmatpush.bf16.msra.mxu1 %v1765_v39 }
 0x2fd   :  { %1088 = vmatpush.bf16.msra.mxu2 %v1767_v40  ;;  %1101 = vmatpush.bf16.msra.mxu3 %v1778_v53 }
 0x300   :  { %1063 = vmatpush.bf16.msra.mxu0 %v1770_v44  ;;  %1076 = vmatpush.bf16.msra.mxu1 %v1774_v48 }
 0x301   :  { %1089 = vmatpush.bf16.msra.mxu2 %v1776_v49  ;;  %1102 = vmatpush.bf16.msra.mxu3 %v1790_v2 }
 0x304   :  { %1064 = vmatpush.bf16.msra.mxu0 %v1782_v60  ;;  %1077 = vmatpush.bf16.msra.mxu1 %v1786_v0 }
 0x305   :  { %1090 = vmatpush.bf16.msra.mxu2 %v1788_v1  ;;  %1103 = vmatpush.bf16.msra.mxu3 %v1796_v10 }
 0x308   :  { %1065 = vmatpush.bf16.msra.mxu0 %v1794_v9  ;;  %1078 = vmatpush.bf16.msra.mxu1 %v1800_v13 }
 0x309   :  { %1091 = vmatpush.bf16.msra.mxu2 %v1802_v14  ;;  %1104 = vmatpush.bf16.msra.mxu3 %v1808_v22 }
 0x30c   :  { %1066 = vmatpush.bf16.msra.mxu0 %v1806_v21  ;;  %1079 = vmatpush.bf16.msra.mxu1 %v1812_v25 }
 0x30d   :  { %1092 = vmatpush.bf16.msra.mxu2 %v1814_v26  ;;  %1105 = vmatpush.bf16.msra.mxu3 %v1820_v34 }
 0x310   :  { %1067 = vmatpush.bf16.msra.mxu0 %v1818_v33  ;;  %1080 = vmatpush.bf16.msra.mxu1 %v1824_v38 }
 0x311   :  { %1093 = vmatpush.bf16.msra.mxu2 %v1826_v41  ;;  %1106 = vmatpush.bf16.msra.mxu3 %v1832_v52 }
 0x314   :  { %1068 = vmatpush.bf16.msra.mxu0 %v1830_v51  ;;  %1081 = vmatpush.bf16.msra.mxu1 %v1836_v56 }
 0x315   :  { %1094 = vmatpush.bf16.msra.mxu2 %v1838_v57  ;;  %1107 = vmatpush.bf16.msra.mxu3 %v1844_v5 }
 0x318   :  { %1069 = vmatpush.bf16.msra.mxu0 %v1842_v4  ;;  %1082 = vmatpush.bf16.msra.mxu1 %v1848_v6 }
 0x319   :  { %1095 = vmatpush.bf16.msra.mxu2 %v1850_v7  ;;  %1108 = vmatpush.bf16.msra.mxu3 %v1856_v12 }
 0x377   :  { %v817_v24 = vpop.f32.mrf.mxu0  ;;  %v830_v28 = vpop.f32.mrf.mxu1 }
 0x378   :  { %v860_v29 = vadd.f32 %v817_v24, %v803_v17  ;;  %v861_v30 = vadd.f32 %v830_v28, %v804_v23 }
 0x37a   :  { %v1470_v31 = vmul.f32 -1.442695, %v860_v29  ;;  %v1471_v32 = vmul.f32 -1.442695, %v861_v30 }
 0x37c   :  { %1585 = vpow2.f32 %v1470_v31 }
 0x37d   :  { %1587 = vpow2.f32 %v1471_v32 }
 0x37e   :  { %v843_v37 = vpop.f32.mrf.mxu2  ;;  %v856_v42 = vpop.f32.mrf.mxu3 }
 0x37f   :  { %v862_v43 = vadd.f32 %v843_v37, %v805_v36  ;;  %v819_v45 = vpop.f32.mrf.mxu0  ;;  %v832_v46 = vpop.f32.mrf.mxu1  ;;  %v863_v59 = vadd.f32 %v856_v42, %v806_v61 }
 0x381   :  { %v1472_v58 = vmul.f32 -1.442695, %v862_v43 }
 0x382   :  { %v1586_v62 = vpop.eup %1585 }
 0x383   :  { %v1588_v8 = vpop.eup %1587  ;;  %v873_v50 = vadd.f32 1.0, %v1586_v62  ;;  %1589 = vpow2.f32 %v1472_v58 }
 0x384   :  { %v874_v3 = vadd.f32 1.0, %v1588_v8 }
 0x385   :  { %1591 = vrcp.f32 %v873_v50  ;;  %v887_v23 = vand.u32 2147483648, %v873_v50  ;;  %v885_v29 = vand.u32 2147483647, %v873_v50  ;;  %vm881_vm2 = vweird.f32 %v873_v50 }
 0x386   :  { %1593 = vrcp.f32 %v874_v3  ;;  %v845_v16 = vpop.f32.mrf.mxu2  ;;  %v858_v11 = vpop.f32.mrf.mxu3  ;;  %v902_v24 = vand.u32 2147483648, %v874_v3  ;;  %v900_v31 = vand.u32 2147483647, %v874_v3  ;;  %vm896_vm3 = vweird.f32 %v874_v3 }
 0x387   :  { %v888_v37 = vor.u32 1.1754944e-38, %v887_v23  ;;  %vm886_vm6 = vcmp.eq.f32.partialorder %v885_v29, 8.507059e+37 }
 0x388   :  { %v903_v43 = vor.u32 1.1754944e-38, %v902_v24  ;;  %vm901_vm7 = vcmp.eq.f32.partialorder %v900_v31, 8.507059e+37 }
 0x389   :  { %v1590_v18 = vpop.eup %1589 }
 0x38a   :  { %v875_v63 = vadd.f32 1.0, %v1590_v18 }
 0x38b   :  { %v1592_v19 = vpop.eup %1591 }
 0x38c   :  { %v1594_v54 = vpop.eup %1593  ;;  %v877_v15 = vmul.f32 %v1592_v19, %v873_v50  ;;  %1595 = vrcp.f32 %v875_v63  ;;  %vm882_vm0 = vweird.f32 %v1592_v19  ;;  %vm911_vm9 = vweird.f32 %v875_v63 }
 0x38d   :  { %v892_v20 = vmul.f32 %v1594_v54, %v874_v3  ;;  %1597 = vtanh.f32 %v863_v59  ;;  %vm897_vm1 = vweird.f32 %v1594_v54  ;;  %vm883_vm4 = vmor %vm881_vm2, %vm882_vm0  ;;  %v917_v59 = vand.u32 2147483648, %v875_v63 }
 0x38e   :  { %v878_v47 = vsub.f32 1.0, %v877_v15  ;;  %vm898_vm5 = vmor %vm896_vm3, %vm897_vm1 }
 0x38f   :  { %v893_v17 = vsub.f32 1.0, %v892_v20  ;;  %v918_v20 = vor.u32 1.1754944e-38, %v917_v59 }
 0x390   :  { %v879_v28 = vmul.f32 %v1592_v19, %v878_v47 }
 0x391   :  { %v894_v30 = vmul.f32 %v1594_v54, %v893_v17 }
 0x392   :  { %v1596_v27 = vpop.eup %1595  ;;  %v880_v32 = vadd.f32 %v1592_v19, %v879_v28 }
 0x393   :  { %v907_v36 = vmul.f32 %v1596_v27, %v875_v63  ;;  %v895_v42 = vadd.f32 %v1594_v54, %v894_v30  ;;  %v1598_v46 = vpop.eup %1597  ;;  %vm912_vm8 = vweird.f32 %v1596_v27 }
 0x394   :  { %v884_v45 = vsel %vm883_vm4, %v1592_v19, %v880_v32  ;;  %v915_v19 = vand.u32 2147483647, %v875_v63  ;;  %vm913_vm10 = vmor %vm911_vm9, %vm912_vm8 }
 0x395   :  { %v908_v58 = vsub.f32 1.0, %v907_v36  ;;  %v889_v62 = vsel %vm886_vm6, %v888_v37, %v884_v45  ;;  %v899_v8 = vsel %vm898_vm5, %v1594_v54, %v895_v42 }
 0x396   :  { %v904_v16 = vsel %vm901_vm7, %v903_v43, %v899_v8  ;;  %v923_v11 = vmul.f32 %v1598_v46, %v889_v62  ;;  %vm916_vm11 = vcmp.eq.f32.partialorder %v915_v19, 8.507059e+37 }
 0x397   :  { %v922_v61 = vmul.f32 %v904_v16, %v2055_v55  ;;  %v909_v18 = vmul.f32 %v1596_v27, %v908_v58 }
 0x399   :  { %v2097_v50 = vadd.f32 %v923_v11, %v922_v61  ;;  %v910_v3 = vadd.f32 %v1596_v27, %v909_v18 }
 0x39b   :  { %1599 = vtanh.f32 %v2097_v50  ;;  %v914_v15 = vsel %vm913_vm10, %v1596_v27, %v910_v3 }
 0x39c   :  { %v919_v47 = vsel %vm916_vm11, %v918_v20, %v914_v15 }
 0x3a1   :  { %v1600_v54 = vpop.eup %1599 }
 0x3a2   :  { %v926_v17 = vmul.f32 %v1600_v54, %v919_v47 }
 0x3a4   :  { %v934_v23 = vpack.c.bf16 %v926_v17, %v926_v17 }
 0x3a6   :  { %943 = vmatmul.bf16.vlgmr.msrb.gmra.mxu0 %v934_v23  ;;  %956 = vmatmul.bf16.vlgmr.msrb.gmra.mxu1 %v934_v23 }
 0x3a7   :  { %969 = vmatmul.bf16.vlgmr.msrb.gmra.mxu2 %v934_v23  ;;  %982 = vmatmul.bf16.vlgmr.msrb.gmra.mxu3 %v934_v23 }
 0x3a8   :  { %1189 = vmatpush.bf16.msrb.mxu0 %v1763_v35  ;;  %1202 = vmatpush.bf16.msrb.mxu1 %v1765_v39  ;;  %v1473_v35 = vld [vmem:[%s2162_s0 + $0x50] sm:$0xff] }
 0x3a9   :  { %1215 = vmatpush.bf16.msrb.mxu2 %v1767_v40  ;;  %1228 = vmatpush.bf16.msrb.mxu3 %v1778_v53  ;;  %v930_v39 = vunpack.c.l.bf16 %v1473_v35  ;;  %v931_v40 = vunpack.c.h.bf16 %v1473_v35 }
 0x3ac   :  { %1190 = vmatpush.bf16.msrb.mxu0 %v1770_v44  ;;  %1203 = vmatpush.bf16.msrb.mxu1 %v1774_v48 }
 0x3ad   :  { %1216 = vmatpush.bf16.msrb.mxu2 %v1776_v49  ;;  %1229 = vmatpush.bf16.msrb.mxu3 %v1790_v2 }
 0x3b0   :  { %1191 = vmatpush.bf16.msrb.mxu0 %v1782_v60  ;;  %1204 = vmatpush.bf16.msrb.mxu1 %v1786_v0  ;;  %v1474_v60 = vld [vmem:[%s2162_s0 + $0x58] sm:$0xff] }
 0x3b1   :  { %1217 = vmatpush.bf16.msrb.mxu2 %v1788_v1  ;;  %1230 = vmatpush.bf16.msrb.mxu3 %v1796_v10  ;;  %v932_v2 = vunpack.c.l.bf16 %v1474_v60 }
 0x3b4   :  { %1192 = vmatpush.bf16.msrb.mxu0 %v1794_v9  ;;  %1205 = vmatpush.bf16.msrb.mxu1 %v1800_v13 }
 0x3b5   :  { %1218 = vmatpush.bf16.msrb.mxu2 %v1802_v14  ;;  %1231 = vmatpush.bf16.msrb.mxu3 %v1808_v22 }
 0x3b8   :  { %1193 = vmatpush.bf16.msrb.mxu0 %v1806_v21  ;;  %1206 = vmatpush.bf16.msrb.mxu1 %v1812_v25 }
 0x3b9   :  { %1219 = vmatpush.bf16.msrb.mxu2 %v1814_v26  ;;  %1232 = vmatpush.bf16.msrb.mxu3 %v1820_v34 }
 0x3bc   :  { %1194 = vmatpush.bf16.msrb.mxu0 %v1818_v33  ;;  %1207 = vmatpush.bf16.msrb.mxu1 %v1824_v38 }
 0x3bd   :  { %1220 = vmatpush.bf16.msrb.mxu2 %v1826_v41  ;;  %1233 = vmatpush.bf16.msrb.mxu3 %v1832_v52 }
 0x3c0   :  { %1195 = vmatpush.bf16.msrb.mxu0 %v1830_v51  ;;  %1208 = vmatpush.bf16.msrb.mxu1 %v1836_v56  ;;  %v933_v51 = vunpack.c.h.bf16 %v1474_v60  ;;  %v1479_v60 = vld [vmem:[%s2162_s0 + $0x68] sm:$0xff] }
 0x3c1   :  { %1221 = vmatpush.bf16.msrb.mxu2 %v1838_v57  ;;  %1234 = vmatpush.bf16.msrb.mxu3 %v1844_v5 }
 0x3c4   :  { %1196 = vmatpush.bf16.msrb.mxu0 %v1842_v4  ;;  %1209 = vmatpush.bf16.msrb.mxu1 %v1848_v6 }
 0x3c5   :  { %1222 = vmatpush.bf16.msrb.mxu2 %v1850_v7  ;;  %1235 = vmatpush.bf16.msrb.mxu3 %v1856_v12 }
 0x423   :  { %v944_v44 = vpop.f32.mrf.mxu0  ;;  %v957_v48 = vpop.f32.mrf.mxu1 }
 0x424   :  { %v987_v49 = vadd.f32 %v944_v44, %v930_v39  ;;  %v988_v53 = vadd.f32 %v957_v48, %v931_v40 }
 0x426   :  { %v1475_v0 = vmul.f32 -1.442695, %v987_v49  ;;  %v1476_v1 = vmul.f32 -1.442695, %v988_v53 }
 0x428   :  { %1601 = vpow2.f32 %v1475_v0 }
 0x429   :  { %1603 = vpow2.f32 %v1476_v1 }
 0x42a   :  { %v970_v9 = vpop.f32.mrf.mxu2  ;;  %v983_v10 = vpop.f32.mrf.mxu3 }
 0x42b   :  { %v989_v13 = vadd.f32 %v970_v9, %v932_v2  ;;  %v946_v14 = vpop.f32.mrf.mxu0  ;;  %v959_v21 = vpop.f32.mrf.mxu1  ;;  %v990_v4 = vadd.f32 %v983_v10, %v933_v51  ;;  %v1059_v2 = vunpack.c.l.bf16 %v1479_v60  ;;  %v1060_v51 = vunpack.c.h.bf16 %v1479_v60  ;;  %v1484_v60 = vld [vmem:[%s2162_s0 + $0x78] sm:$0xff] }
 0x42d   :  { %v1477_v22 = vmul.f32 -1.442695, %v989_v13 }
 0x42e   :  { %v1602_v25 = vpop.eup %1601 }
 0x42f   :  { %v1604_v26 = vpop.eup %1603  ;;  %v1000_v33 = vadd.f32 1.0, %v1602_v25  ;;  %1605 = vpow2.f32 %v1477_v22 }
 0x430   :  { %v1001_v34 = vadd.f32 1.0, %v1604_v26 }
 0x431   :  { %1607 = vrcp.f32 %v1000_v33  ;;  %v1014_v63 = vand.u32 2147483648, %v1000_v33  ;;  %v1012_v29 = vand.u32 2147483647, %v1000_v33  ;;  %vm1008_vm14 = vweird.f32 %v1000_v33 }
 0x432   :  { %1609 = vrcp.f32 %v1001_v34  ;;  %v972_v38 = vpop.f32.mrf.mxu2  ;;  %v985_v41 = vpop.f32.mrf.mxu3  ;;  %v1029_v24 = vand.u32 2147483648, %v1001_v34  ;;  %v1027_v31 = vand.u32 2147483647, %v1001_v34  ;;  %vm1023_vm15 = vweird.f32 %v1001_v34 }
 0x433   :  { %v1015_v37 = vor.u32 1.1754944e-38, %v1014_v63  ;;  %vm1013_vm2 = vcmp.eq.f32.partialorder %v1012_v29, 8.507059e+37 }
 0x434   :  { %v1030_v43 = vor.u32 1.1754944e-38, %v1029_v24  ;;  %vm1028_vm3 = vcmp.eq.f32.partialorder %v1027_v31, 8.507059e+37 }
 0x435   :  { %v1606_v52 = vpop.eup %1605 }
 0x436   :  { %v1002_v56 = vadd.f32 1.0, %v1606_v52 }
 0x437   :  { %v1608_v57 = vpop.eup %1607 }
 0x438   :  { %v1610_v5 = vpop.eup %1609  ;;  %v1004_v6 = vmul.f32 %v1608_v57, %v1000_v33  ;;  %1611 = vrcp.f32 %v1002_v56  ;;  %vm1009_vm12 = vweird.f32 %v1608_v57  ;;  %v1044_v19 = vand.u32 2147483648, %v1002_v56 }
 0x439   :  { %v1019_v7 = vmul.f32 %v1610_v5, %v1001_v34  ;;  %1613 = vtanh.f32 %v990_v4  ;;  %vm1024_vm13 = vweird.f32 %v1610_v5  ;;  %vm1010_vm0 = vmor %vm1008_vm14, %vm1009_vm12  ;;  %vm1038_vm5 = vweird.f32 %v1002_v56 }
 0x43a   :  { %v1005_v12 = vsub.f32 1.0, %v1004_v6  ;;  %vm1025_vm1 = vmor %vm1023_vm15, %vm1024_vm13  ;;  %v1042_v15 = vand.u32 2147483647, %v1002_v56  ;;  %v1045_v54 = vor.u32 1.1754944e-38, %v1044_v19 }
 0x43b   :  { %v1020_v55 = vsub.f32 1.0, %v1019_v7 }
 0x43c   :  { %v1006_v28 = vmul.f32 %v1608_v57, %v1005_v12  ;;  %vm1043_vm7 = vcmp.eq.f32.partialorder %v1042_v15, 8.507059e+37 }
 0x43d   :  { %v1021_v30 = vmul.f32 %v1610_v5, %v1020_v55 }
 0x43e   :  { %v1612_v27 = vpop.eup %1611  ;;  %v1007_v32 = vadd.f32 %v1608_v57, %v1006_v28 }
 0x43f   :  { %v1034_v36 = vmul.f32 %v1612_v27, %v1002_v56  ;;  %v1022_v42 = vadd.f32 %v1610_v5, %v1021_v30  ;;  %v1614_v46 = vpop.eup %1613  ;;  %vm1039_vm4 = vweird.f32 %v1612_v27 }
 0x440   :  { %v1011_v45 = vsel %vm1010_vm0, %v1608_v57, %v1007_v32  ;;  %vm1040_vm6 = vmor %vm1038_vm5, %vm1039_vm4 }
 0x441   :  { %v1035_v58 = vsub.f32 1.0, %v1034_v36  ;;  %v1016_v62 = vsel %vm1013_vm2, %v1015_v37, %v1011_v45  ;;  %v1026_v8 = vsel %vm1025_vm1, %v1610_v5, %v1022_v42 }
 0x442   :  { %v1031_v16 = vsel %vm1028_vm3, %v1030_v43, %v1026_v8  ;;  %v1050_v11 = vmul.f32 %v1614_v46, %v1016_v62 }
 0x443   :  { %v1049_v61 = vmul.f32 %v1031_v16, %v2097_v50  ;;  %v1036_v18 = vmul.f32 %v1612_v27, %v1035_v58  ;;  %v1478_v50 = vld [vmem:[%s2162_s0 + $0x60] sm:$0xff] }
 0x444   :  { %v1057_v39 = vunpack.c.l.bf16 %v1478_v50  ;;  %v1058_v40 = vunpack.c.h.bf16 %v1478_v50 }
 0x445   :  { %v2139_v3 = vadd.f32 %v1050_v11, %v1049_v61  ;;  %v1037_v59 = vadd.f32 %v1612_v27, %v1036_v18 }
 0x447   :  { %1615 = vtanh.f32 %v2139_v3  ;;  %v1041_v20 = vsel %vm1040_vm6, %v1612_v27, %v1037_v59 }
 0x448   :  { %v1046_v17 = vsel %vm1043_vm7, %v1045_v54, %v1041_v20 }
 0x44d   :  { %v1616_v47 = vpop.eup %1615 }
 0x44e   :  { %v1053_v23 = vmul.f32 %v1616_v47, %v1046_v17 }
 0x450   :  { %v1061_v35 = vpack.c.bf16 %v1053_v23, %v1053_v23 }
 0x452   :  { %1070 = vmatmul.bf16.vlgmr.msra.gmra.mxu0 %v1061_v35  ;;  %1083 = vmatmul.bf16.vlgmr.msra.gmra.mxu1 %v1061_v35 }
 0x453   :  { %1096 = vmatmul.bf16.vlgmr.msra.gmra.mxu2 %v1061_v35  ;;  %1109 = vmatmul.bf16.vlgmr.msra.gmra.mxu3 %v1061_v35 }
 0x4cf   :  { %v1071_v44 = vpop.f32.mrf.mxu0  ;;  %v1084_v48 = vpop.f32.mrf.mxu1 }
 0x4d0   :  { %v1114_v49 = vadd.f32 %v1071_v44, %v1057_v39  ;;  %v1115_v53 = vadd.f32 %v1084_v48, %v1058_v40 }
 0x4d2   :  { %v1480_v0 = vmul.f32 -1.442695, %v1114_v49  ;;  %v1481_v1 = vmul.f32 -1.442695, %v1115_v53 }
 0x4d4   :  { %1617 = vpow2.f32 %v1480_v0 }
 0x4d5   :  { %1619 = vpow2.f32 %v1481_v1 }
 0x4d6   :  { %v1097_v9 = vpop.f32.mrf.mxu2  ;;  %v1110_v10 = vpop.f32.mrf.mxu3 }
 0x4d7   :  { %v1116_v13 = vadd.f32 %v1097_v9, %v1059_v2  ;;  %v1073_v14 = vpop.f32.mrf.mxu0  ;;  %v1086_v21 = vpop.f32.mrf.mxu1  ;;  %v1117_v4 = vadd.f32 %v1110_v10, %v1060_v51  ;;  %v1186_v2 = vunpack.c.l.bf16 %v1484_v60  ;;  %v1187_v51 = vunpack.c.h.bf16 %v1484_v60 }
 0x4d9   :  { %v1482_v22 = vmul.f32 -1.442695, %v1116_v13 }
 0x4da   :  { %v1618_v25 = vpop.eup %1617 }
 0x4db   :  { %v1620_v26 = vpop.eup %1619  ;;  %v1127_v33 = vadd.f32 1.0, %v1618_v25  ;;  %1621 = vpow2.f32 %v1482_v22 }
 0x4dc   :  { %v1128_v34 = vadd.f32 1.0, %v1620_v26 }
 0x4dd   :  { %1623 = vrcp.f32 %v1127_v33  ;;  %v1141_v63 = vand.u32 2147483648, %v1127_v33  ;;  %v1139_v29 = vand.u32 2147483647, %v1127_v33  ;;  %vm1135_vm10 = vweird.f32 %v1127_v33 }
 0x4de   :  { %1625 = vrcp.f32 %v1128_v34  ;;  %v1099_v38 = vpop.f32.mrf.mxu2  ;;  %v1112_v41 = vpop.f32.mrf.mxu3  ;;  %v1156_v24 = vand.u32 2147483648, %v1128_v34  ;;  %v1154_v31 = vand.u32 2147483647, %v1128_v34  ;;  %vm1150_vm11 = vweird.f32 %v1128_v34 }
 0x4df   :  { %v1142_v37 = vor.u32 1.1754944e-38, %v1141_v63  ;;  %vm1140_vm14 = vcmp.eq.f32.partialorder %v1139_v29, 8.507059e+37 }
 0x4e0   :  { %v1157_v43 = vor.u32 1.1754944e-38, %v1156_v24  ;;  %vm1155_vm15 = vcmp.eq.f32.partialorder %v1154_v31, 8.507059e+37 }
 0x4e1   :  { %v1622_v52 = vpop.eup %1621 }
 0x4e2   :  { %v1129_v56 = vadd.f32 1.0, %v1622_v52 }
 0x4e3   :  { %v1624_v57 = vpop.eup %1623 }
 0x4e4   :  { %v1626_v5 = vpop.eup %1625  ;;  %v1131_v6 = vmul.f32 %v1624_v57, %v1127_v33  ;;  %1627 = vrcp.f32 %v1129_v56  ;;  %vm1136_vm8 = vweird.f32 %v1624_v57  ;;  %v1171_v15 = vand.u32 2147483648, %v1129_v56 }
 0x4e5   :  { %v1146_v7 = vmul.f32 %v1626_v5, %v1128_v34  ;;  %1629 = vtanh.f32 %v1117_v4  ;;  %vm1151_vm9 = vweird.f32 %v1626_v5  ;;  %vm1137_vm12 = vmor %vm1135_vm10, %vm1136_vm8  ;;  %vm1165_vm1 = vweird.f32 %v1129_v56 }
 0x4e6   :  { %v1132_v12 = vsub.f32 1.0, %v1131_v6  ;;  %vm1152_vm13 = vmor %vm1150_vm11, %vm1151_vm9  ;;  %v1169_v20 = vand.u32 2147483647, %v1129_v56  ;;  %v1172_v47 = vor.u32 1.1754944e-38, %v1171_v15 }
 0x4e7   :  { %v1147_v55 = vsub.f32 1.0, %v1146_v7 }
 0x4e8   :  { %v1133_v28 = vmul.f32 %v1624_v57, %v1132_v12  ;;  %vm1170_vm3 = vcmp.eq.f32.partialorder %v1169_v20, 8.507059e+37 }
 0x4e9   :  { %v1148_v30 = vmul.f32 %v1626_v5, %v1147_v55 }
 0x4ea   :  { %v1628_v27 = vpop.eup %1627  ;;  %v1134_v32 = vadd.f32 %v1624_v57, %v1133_v28 }
 0x4eb   :  { %v1161_v36 = vmul.f32 %v1628_v27, %v1129_v56  ;;  %v1149_v42 = vadd.f32 %v1626_v5, %v1148_v30  ;;  %v1630_v46 = vpop.eup %1629  ;;  %vm1166_vm0 = vweird.f32 %v1628_v27 }
 0x4ec   :  { %v1138_v45 = vsel %vm1137_vm12, %v1624_v57, %v1134_v32  ;;  %vm1167_vm2 = vmor %vm1165_vm1, %vm1166_vm0 }
 0x4ed   :  { %v1162_v58 = vsub.f32 1.0, %v1161_v36  ;;  %v1143_v62 = vsel %vm1140_vm14, %v1142_v37, %v1138_v45  ;;  %v1153_v8 = vsel %vm1152_vm13, %v1626_v5, %v1149_v42 }
 0x4ee   :  { %v1158_v16 = vsel %vm1155_vm15, %v1157_v43, %v1153_v8  ;;  %v1177_v11 = vmul.f32 %v1630_v46, %v1143_v62 }
 0x4ef   :  { %v1176_v61 = vmul.f32 %v1158_v16, %v2139_v3  ;;  %v1163_v18 = vmul.f32 %v1628_v27, %v1162_v58  ;;  %v1483_v3 = vld [vmem:[%s2162_s0 + $0x70] sm:$0xff] }
 0x4f0   :  { %v1184_v39 = vunpack.c.l.bf16 %v1483_v3  ;;  %v1185_v40 = vunpack.c.h.bf16 %v1483_v3 }
 0x4f1   :  { %v2149_v59 = vadd.f32 %v1177_v11, %v1176_v61  ;;  %v1164_v19 = vadd.f32 %v1628_v27, %v1163_v18 }
 0x4f3   :  { %1631 = vtanh.f32 %v2149_v59  ;;  %v1168_v54 = vsel %vm1167_vm2, %v1628_v27, %v1164_v19 }
 0x4f4   :  { %v1173_v23 = vsel %vm1170_vm3, %v1172_v47, %v1168_v54 }
 0x4f9   :  { %v1632_v17 = vpop.eup %1631 }
 0x4fa   :  { %v1180_v35 = vmul.f32 %v1632_v17, %v1173_v23 }
 0x4fc   :  { %v1188_v50 = vpack.c.bf16 %v1180_v35, %v1180_v35 }
 0x4fe   :  { %1197 = vmatmul.bf16.vlgmr.msrb.gmra.mxu0 %v1188_v50  ;;  %1210 = vmatmul.bf16.vlgmr.msrb.gmra.mxu1 %v1188_v50 }
 0x4ff   :  { %1223 = vmatmul.bf16.vlgmr.msrb.gmra.mxu2 %v1188_v50  ;;  %1236 = vmatmul.bf16.vlgmr.msrb.gmra.mxu3 %v1188_v50 }
 0x57b   :  { %v1198_v44 = vpop.f32.mrf.mxu0  ;;  %v1211_v48 = vpop.f32.mrf.mxu1 }
 0x57c   :  { %v1241_v49 = vadd.f32 %v1198_v44, %v1184_v39  ;;  %v1242_v53 = vadd.f32 %v1211_v48, %v1185_v40 }
 0x57e   :  { %v1485_v0 = vmul.f32 -1.442695, %v1241_v49  ;;  %v1486_v1 = vmul.f32 -1.442695, %v1242_v53 }
 0x580   :  { %1633 = vpow2.f32 %v1485_v0 }
 0x581   :  { %1635 = vpow2.f32 %v1486_v1 }
 0x582   :  { %v1224_v9 = vpop.f32.mrf.mxu2  ;;  %v1237_v10 = vpop.f32.mrf.mxu3 }
 0x583   :  { %v1243_v13 = vadd.f32 %v1224_v9, %v1186_v2  ;;  %v1200_v14 = vpop.f32.mrf.mxu0  ;;  %v1213_v21 = vpop.f32.mrf.mxu1  ;;  %v1244_v4 = vadd.f32 %v1237_v10, %v1187_v51 }
 0x585   :  { %v1487_v22 = vmul.f32 -1.442695, %v1243_v13 }
 0x586   :  { %v1634_v25 = vpop.eup %1633 }
 0x587   :  { %v1636_v26 = vpop.eup %1635  ;;  %v1254_v33 = vadd.f32 1.0, %v1634_v25  ;;  %1637 = vpow2.f32 %v1487_v22 }
 0x588   :  { %v1255_v34 = vadd.f32 1.0, %v1636_v26 }
 0x589   :  { %1639 = vrcp.f32 %v1254_v33  ;;  %v1268_v63 = vand.u32 2147483648, %v1254_v33  ;;  %v1266_v29 = vand.u32 2147483647, %v1254_v33  ;;  %vm1262_vm6 = vweird.f32 %v1254_v33 }
 0x58a   :  { %1641 = vrcp.f32 %v1255_v34  ;;  %v1226_v38 = vpop.f32.mrf.mxu2  ;;  %v1239_v41 = vpop.f32.mrf.mxu3  ;;  %v1283_v24 = vand.u32 2147483648, %v1255_v34  ;;  %v1281_v31 = vand.u32 2147483647, %v1255_v34  ;;  %vm1277_vm7 = vweird.f32 %v1255_v34 }
 0x58b   :  { %v1269_v37 = vor.u32 1.1754944e-38, %v1268_v63  ;;  %vm1267_vm10 = vcmp.eq.f32.partialorder %v1266_v29, 8.507059e+37 }
 0x58c   :  { %v1284_v43 = vor.u32 1.1754944e-38, %v1283_v24  ;;  %vm1282_vm11 = vcmp.eq.f32.partialorder %v1281_v31, 8.507059e+37 }
 0x58d   :  { %v1638_v52 = vpop.eup %1637 }
 0x58e   :  { %v1256_v56 = vadd.f32 1.0, %v1638_v52 }
 0x58f   :  { %v1640_v57 = vpop.eup %1639 }
 0x590   :  { %v1642_v5 = vpop.eup %1641  ;;  %v1258_v6 = vmul.f32 %v1640_v57, %v1254_v33  ;;  %1643 = vrcp.f32 %v1256_v56  ;;  %vm1263_vm4 = vweird.f32 %v1640_v57  ;;  %v1298_v20 = vand.u32 2147483648, %v1256_v56 }
 0x591   :  { %v1273_v7 = vmul.f32 %v1642_v5, %v1255_v34  ;;  %1645 = vtanh.f32 %v1244_v4  ;;  %vm1278_vm5 = vweird.f32 %v1642_v5  ;;  %vm1264_vm8 = vmor %vm1262_vm6, %vm1263_vm4  ;;  %vm1292_vm13 = vweird.f32 %v1256_v56 }
 0x592   :  { %v1259_v12 = vsub.f32 1.0, %v1258_v6  ;;  %vm1279_vm9 = vmor %vm1277_vm7, %vm1278_vm5  ;;  %v1296_v54 = vand.u32 2147483647, %v1256_v56  ;;  %v1299_v17 = vor.u32 1.1754944e-38, %v1298_v20 }
 0x593   :  { %v1274_v55 = vsub.f32 1.0, %v1273_v7 }
 0x594   :  { %v1260_v28 = vmul.f32 %v1640_v57, %v1259_v12  ;;  %vm1297_vm15 = vcmp.eq.f32.partialorder %v1296_v54, 8.507059e+37 }
 0x595   :  { %v1275_v30 = vmul.f32 %v1642_v5, %v1274_v55 }
 0x596   :  { %v1644_v27 = vpop.eup %1643  ;;  %v1261_v32 = vadd.f32 %v1640_v57, %v1260_v28 }
 0x597   :  { %v1288_v36 = vmul.f32 %v1644_v27, %v1256_v56  ;;  %v1276_v42 = vadd.f32 %v1642_v5, %v1275_v30  ;;  %v1646_v46 = vpop.eup %1645  ;;  %vm1293_vm12 = vweird.f32 %v1644_v27 }
 0x598   :  { %v1265_v45 = vsel %vm1264_vm8, %v1640_v57, %v1261_v32  ;;  %vm1294_vm14 = vmor %vm1292_vm13, %vm1293_vm12 }
 0x599   :  { %v1289_v58 = vsub.f32 1.0, %v1288_v36  ;;  %v1270_v62 = vsel %vm1267_vm10, %v1269_v37, %v1265_v45  ;;  %v1280_v8 = vsel %vm1279_vm9, %v1642_v5, %v1276_v42 }
 0x59a   :  { %v1285_v16 = vsel %vm1282_vm11, %v1284_v43, %v1280_v8  ;;  %v1304_v11 = vmul.f32 %v1646_v46, %v1270_v62 }
 0x59b   :  { %v1290_v61 = vmul.f32 %v1644_v27, %v1289_v58  ;;  %v1303_v18 = vmul.f32 %v1285_v16, %v2149_v59 }
 0x59d   :  { %v1305_v19 = vadd.f32 %v1304_v11, %v1303_v18  ;;  %v1291_v15 = vadd.f32 %v1644_v27, %v1290_v61 }
 0x59f   :  { %1647 = vtanh.f32 %v1305_v19  ;;  %v1295_v47 = vsel %vm1294_vm14, %v1644_v27, %v1291_v15 }
 0x5a0   :  { %v1300_v35 = vsel %vm1297_vm15, %v1299_v17, %v1295_v47 }
 0x5a5   :  { %v1648_v23 = vpop.eup %1647 }
 0x5a6   :  { %v1307_v50 = vmul.f32 %v1648_v23, %v1300_v35 }
 0x5a8   :  { %1313 = vst [vmem:[%s2164_s2] sm:$0xff] %v1307_v50 }

</bundles_post_ra>
